<compile_context>
chip_gen: v7x
topology: tpu7x:2x2x1
jax: 0.10.0
libtpu: 0.0.40
codegen_flags: <defaults>
</compile_context>

<pallas_src>
import jax
import jax.numpy as jnp
import numpy as np
from jax.experimental import pallas as pl
from jax.experimental.pallas import tpu as pltpu

EPS = 1e-5
PAD = 128   # lane zero-pad around the in-kernel conv operands (>= W + 1)


def _upsample_matrix_np(n_in, n_out):
    """nn.Upsample(scale_factor=2, mode='bilinear', align_corners=True) as a
    dense (n_out, n_in) interpolation matrix (numpy, trace-time constant)."""
    if n_in == 1:
        return np.ones((n_out, 1), np.float32)
    coords = np.arange(n_out, dtype=np.float64) * (n_in - 1) / (n_out - 1)
    lo = np.clip(np.floor(coords).astype(np.int64), 0, n_in - 2)
    frac = (coords - lo).astype(np.float32)
    m = np.zeros((n_out, n_in), np.float32)
    m[np.arange(n_out), lo] += 1.0 - frac
    m[np.arange(n_out), lo + 1] += frac
    return m


# ----------------------------------------------------------------------------
# Fused kernel: upsample(x1) ⊕ concat(x2) -> conv3x3 -> BN -> ReLU -> conv3x3
#               -> BN -> ReLU, all in VMEM / vregs.
# ----------------------------------------------------------------------------
def make_up_double_conv_kernel(N, H, W, C1, C2, Cmid, Cout):
    HW = H * W
    L = N * HW                      # lane extent of the output (512)
    assert PAD >= W + 1
    taps = [(ky, kx) for ky in range(3) for kx in range(3)]

    def kernel(x1b_ref, upm_ref, s2_ref, msk_ref, wts_ref, bnp_ref,
               out_ref, s1_scr, sy_scr):
        f32 = jnp.float32

        # ---- bilinear 2x upsample (+ centre pad): ONE shared-matrix matmul,
        # batch folded onto sublanes (no N-fold block-diagonal zero work).
        x1u_b = jnp.dot(x1b_ref[...], upm_ref[...],
                        preferred_element_type=f32)           # (N*C1, H*W)
        # rows (n, c) -> lane-dense (C1, N*H*W)
        x1u = jnp.concatenate(
            [x1u_b[n * C1:(n + 1) * C1, :] for n in range(N)], axis=1)

        # ---- stack the 9 shifted/masked x1u tap windows (taps on sublanes)
        # so conv1's x1u half is ONE K=9*C1 matmul instead of 9 K=C1 dots.
        zpad1 = jnp.zeros((C1, PAD), f32)
        xe = jnp.concatenate([zpad1, x1u, zpad1], axis=1)     # (C1, L + 2*PAD)
        for t, (ky, kx) in enumerate(taps):
            sft = (ky - 1) * W + (kx - 1)
            win = x1u if sft == 0 else xe[:, PAD + sft:PAD + sft + L]
            if not (ky == 1 and kx == 1):
                win = win * msk_ref[t:t + 1, :]               # precomputed mask
            s1_scr[t * C1:(t + 1) * C1, :] = win

        # ---- conv1 = two stacked-K matmuls (x2 taps pre-stacked on host).
        # Conv biases dropped: cancelled exactly by training-mode BN below.
        w1a = wts_ref[0:Cmid, 0:9 * C2]                       # (Cmid, 9*C2)
        w1b = wts_ref[Cmid:2 * Cmid, 0:9 * C1]                # (Cmid, 9*C1)
        acc1 = (jnp.dot(w1a, s2_ref[...], preferred_element_type=f32)
                + jnp.dot(w1b, s1_scr[...], preferred_element_type=f32))

        # ---- BatchNorm1 (training-mode batch stats, two-pass var) + ReLU.
        g1 = bnp_ref[0:Cmid, :]
        be1 = bnp_ref[Cmid:2 * Cmid, :]
        mean1 = jnp.mean(acc1, axis=1, keepdims=True)
        d1 = acc1 - mean1
        var1 = jnp.mean(d1 * d1, axis=1, keepdims=True)
        y1 = jnp.maximum(d1 * (jax.lax.rsqrt(var1 + EPS) * g1) + be1, 0.0)

        # ---- conv2: stack the 9 y1 tap windows, ONE K=9*Cmid matmul.
        zpad2 = jnp.zeros((Cmid, PAD), f32)
        ye = jnp.concatenate([zpad2, y1, zpad2], axis=1)      # (Cmid, L+2*PAD)
        for t, (ky, kx) in enumerate(taps):
            sft = (ky - 1) * W + (kx - 1)
            win = y1 if sft == 0 else ye[:, PAD + sft:PAD + sft + L]
            if not (ky == 1 and kx == 1):
                win = win * msk_ref[t:t + 1, :]
            sy_scr[t * Cmid:(t + 1) * Cmid, :] = win

        w2m = wts_ref[2 * Cmid:2 * Cmid + Cout, 0:9 * Cmid]   # (Cout, 9*Cmid)
        acc2 = jnp.dot(w2m, sy_scr[...], preferred_element_type=f32)

        # ---- BatchNorm2 + ReLU; unmasked lane-dense (Cout, L) store.
        g2 = bnp_ref[2 * Cmid:2 * Cmid + Cout, :]
        be2 = bnp_ref[2 * Cmid + Cout:2 * (Cmid + Cout), :]
        mean2 = jnp.mean(acc2, axis=1, keepdims=True)
        d2 = acc2 - mean2
        var2 = jnp.mean(d2 * d2, axis=1, keepdims=True)
        out_ref[...] = jnp.maximum(
            d2 * (jax.lax.rsqrt(var2 + EPS) * g2) + be2, 0.0)

    return kernel


# ----------------------------------------------------------------------------
# Wrapper: layout plumbing only (transposes / tap pre-shift of the x2 input /
# numpy constants); the hot path runs in the single Pallas kernel above.
# ----------------------------------------------------------------------------
@jax.jit
def up_forward(x1, x2, params):
    """x1: (N, C1, h, w) NCHW, x2: (N, C2, H, W) NCHW. Returns (N, Cout, H, W)."""
    N, C1, h, w = x1.shape
    _, C2, H, W = x2.shape
    Cmid = params["w1"].shape[-1]
    Cout = params["w2"].shape[-1]
    L = N * H * W

    # ---- trace-time numpy constants (baked literals, no per-call XLA chain).
    mh = _upsample_matrix_np(h, 2 * h)                        # (2h, h)
    mw = _upsample_matrix_np(w, 2 * w)                        # (2w, w)
    dyp, dxp = H - 2 * h, W - 2 * w
    mh = np.pad(mh, ((dyp // 2, dyp - dyp // 2), (0, 0)))     # (H, h) centre pad
    mw = np.pad(mw, ((dxp // 2, dxp - dxp // 2), (0, 0)))     # (W, w)
    upm = np.ascontiguousarray(np.kron(mh, mw).T, np.float32)  # (h*w, H*W), shared over batch

    ll = np.arange(L)
    yy = (ll // W) % H
    xx = ll % W
    masks = np.stack(
        [(((yy + ky - 1) >= 0) & ((yy + ky - 1) < H)
          & ((xx + kx - 1) >= 0) & ((xx + kx - 1) < W)).astype(np.float32)
         for ky in range(3) for kx in range(3)], axis=0)      # (9, L)

    # ---- lane-dense operands: channels on sublanes, (n, y, x) on lanes.
    x1b = x1.reshape(N * C1, h * w)                           # rows = (n, c)

    # x2's 9 tap windows pre-stacked on the host (static shifts; boundary
    # masks baked in via zero padding) -> no in-kernel shifts for this half.
    x2p = jnp.pad(x2, ((0, 0), (0, 0), (1, 1), (1, 1)))
    s2 = jnp.concatenate(
        [x2p[:, :, ky:ky + H, kx:kx + W].transpose(1, 0, 2, 3).reshape(C2, L)
         for ky in range(3) for kx in range(3)], axis=0)      # (9*C2, L)

    # ---- conv weights, tap-major, packed into one array.  Concat order in
    # the module is [x2, x1].  Conv biases are NOT passed: cancelled by BN.
    w1 = params["w1"]                                         # (3,3,C2+C1,Cmid)
    w1a = w1[:, :, :C2, :].transpose(3, 0, 1, 2).reshape(Cmid, 9 * C2)
    w1b = w1[:, :, C2:, :].transpose(3, 0, 1, 2).reshape(Cmid, 9 * C1)
    w2m = params["w2"].transpose(3, 0, 1, 2).reshape(Cout, 9 * Cmid)
    kmax = max(9 * C2, 9 * C1, 9 * Cmid)
    pad_k = lambda a: jnp.pad(a, ((0, 0), (0, kmax - a.shape[1])))
    wts = jnp.concatenate([pad_k(w1a), pad_k(w1b), pad_k(w2m)], axis=0)

    # batch-norm affine params packed into a single (2*Cmid+2*Cout, 1) input.
    bnp = jnp.concatenate([params["g1"], params["be1"],
                           params["g2"], params["be2"]]).reshape(-1, 1)

    args = (x1b, jnp.asarray(upm), s2, jnp.asarray(masks), wts, bnp)

    def full_spec(a):
        nd = a.ndim
        return pl.BlockSpec(a.shape, lambda i, _nd=nd: (0,) * _nd)

    out = pl.pallas_call(
        make_up_double_conv_kernel(N, H, W, C1, C2, Cmid, Cout),
        out_shape=jax.ShapeDtypeStruct((Cout, L), jnp.float32),
        grid=(1,),
        in_specs=[full_spec(a) for a in args],
        out_specs=pl.BlockSpec((Cout, L), lambda i: (0, 0)),
        scratch_shapes=[pltpu.VMEM((9 * C1, L), jnp.float32),
                        pltpu.VMEM((9 * Cmid, L), jnp.float32)],
        compiler_params=pltpu.CompilerParams(
            dimension_semantics=("arbitrary",)),
    )(*args)
    # TODO(synk): at larger N/H/W, add a 'parallel' grid axis over row-bands
    # (BN as partial sums + finalize) to use v7x's 2nd TensorCore, and switch
    # the dense upsample matrix to separable row/col matmuls so tiles stay
    # inside v7x's 64 MiB VMEM.
    return out.reshape(Cout, N, H, W).transpose(1, 0, 2, 3)   # back to NCHW


# ----------------------------------------------------------------------------
# Pure-JAX reference (mirrors the PyTorch module, NCHW, training-mode BN).
# ----------------------------------------------------------------------------
def ref_forward(x1, x2, params):
    _, _, h, w = x1.shape
    _, _, H, W = x2.shape
    mh = jnp.asarray(_upsample_matrix_np(h, 2 * h))
    mw = jnp.asarray(_upsample_matrix_np(w, 2 * w))
    x1u = jnp.einsum("oh,pw,nchw->ncop", mh, mw, x1)
    dyp, dxp = H - x1u.shape[2], W - x1u.shape[3]
    x1u = jnp.pad(x1u, ((0, 0), (0, 0),
                        (dyp // 2, dyp - dyp // 2),
                        (dxp // 2, dxp - dxp // 2)))
    x = jnp.concatenate([x2, x1u], axis=1)

    def conv_bn_relu(xv, wv, b, g, be):
        y = jax.lax.conv_general_dilated(
            xv, wv, (1, 1), "SAME",
            dimension_numbers=("NCHW", "HWIO", "NCHW")) + b.reshape(1, -1, 1, 1)
        m = y.mean(axis=(0, 2, 3), keepdims=True)
        v = ((y - m) ** 2).mean(axis=(0, 2, 3), keepdims=True)
        y = (y - m) * jax.lax.rsqrt(v + EPS) * g.reshape(1, -1, 1, 1) \
            + be.reshape(1, -1, 1, 1)
        return jnp.maximum(y, 0.0)

    y = conv_bn_relu(x, params["w1"], params["b1"], params["g1"], params["be1"])
    y = conv_bn_relu(y, params["w2"], params["b2"], params["g2"], params["be2"])
    return y


def make_params(key, cin, cmid, cout):
    ks = jax.random.split(key, 8)
    return {
        "w1": 0.1 * jax.random.normal(ks[0], (3, 3, cin, cmid), jnp.float32),
        "b1": 0.1 * jax.random.normal(ks[1], (cmid,), jnp.float32),
        "g1": 1.0 + 0.1 * jax.random.normal(ks[2], (cmid,), jnp.float32),
        "be1": 0.1 * jax.random.normal(ks[3], (cmid,), jnp.float32),
        "w2": 0.1 * jax.random.normal(ks[4], (3, 3, cmid, cout), jnp.float32),
        "b2": 0.1 * jax.random.normal(ks[5], (cout,), jnp.float32),
        "g2": 1.0 + 0.1 * jax.random.normal(ks[6], (cout,), jnp.float32),
        "be2": 0.1 * jax.random.normal(ks[7], (cout,), jnp.float32),
    }


if __name__ == "__main__":
    # Up(in_channels=8, out_channels=4, bilinear=True)
    IN_CH, OUT_CH = 8, 4
    N, H, W = 2, 16, 16

    key = jax.random.PRNGKey(0)
    k1, k2, kp = jax.random.split(key, 3)

    # NCHW inputs, matching the PyTorch module.
    x1 = jax.random.normal(k1, (N, IN_CH - OUT_CH, H // 2, W // 2), jnp.float32)
    x2 = jax.random.normal(k2, (N, OUT_CH, H, W), jnp.float32)

    params = make_params(kp, IN_CH, OUT_CH, OUT_CH)

    out = jax.block_until_ready(up_forward(x1, x2, params))
    ref = jax.block_until_ready(ref_forward(x1, x2, params))

    assert out.shape == (N, OUT_CH, H, W), out.shape
    np.testing.assert_allclose(np.asarray(out), np.asarray(ref),
                               rtol=1e-4, atol=2e-4)
    print("KERNEL_OK")
</pallas_src>

<mosaic_0001>
module attributes {stable_mosaic.version = 11 : i64} {
  func.func @kernel(%arg0: i32, %arg1: memref<8x64xf32, #tpu.memory_space<vmem>>, %arg2: memref<64x256xf32, #tpu.memory_space<vmem>>, %arg3: memref<36x512xf32, #tpu.memory_space<vmem>>, %arg4: memref<9x512xf32, #tpu.memory_space<vmem>>, %arg5: memref<12x36xf32, #tpu.memory_space<vmem>>, %arg6: memref<16x1xf32, #tpu.memory_space<vmem>>, %arg7: memref<4x512xf32, #tpu.memory_space<vmem>>, %arg8: memref<36x512xf32, #tpu.memory_space<vmem>>, %arg9: memref<36x512xf32, #tpu.memory_space<vmem>>) attributes {dimension_semantics = [#tpu.dimension_semantics<arbitrary>], iteration_bounds = array<i64: 1>, scalar_prefetch = 0 : i64, scratch_operands = 2 : i64, tpu.core_type = #tpu.core_type<tc>, window_params = [{pipeline_mode = #tpu.pipeline_mode<synchronous>, transform_indices = @transform_0, window_bounds = array<i64: 8, 64>}, {pipeline_mode = #tpu.pipeline_mode<synchronous>, transform_indices = @transform_1, window_bounds = array<i64: 64, 256>}, {pipeline_mode = #tpu.pipeline_mode<synchronous>, transform_indices = @transform_2, window_bounds = array<i64: 36, 512>}, {pipeline_mode = #tpu.pipeline_mode<synchronous>, transform_indices = @transform_3, window_bounds = array<i64: 9, 512>}, {pipeline_mode = #tpu.pipeline_mode<synchronous>, transform_indices = @transform_4, window_bounds = array<i64: 12, 36>}, {pipeline_mode = #tpu.pipeline_mode<synchronous>, transform_indices = @transform_5, window_bounds = array<i64: 16, 1>}, {pipeline_mode = #tpu.pipeline_mode<synchronous>, transform_indices = @transform_6, window_bounds = array<i64: 4, 512>}]} {
    %c0 = arith.constant 0 : index
    %c0_0 = arith.constant 0 : index
    %0 = vector.load %arg1[%c0, %c0_0] : memref<8x64xf32, #tpu.memory_space<vmem>>, vector<8x64xf32>
    %c0_1 = arith.constant 0 : index
    %c0_2 = arith.constant 0 : index
    %1 = vector.load %arg2[%c0_1, %c0_2] : memref<64x256xf32, #tpu.memory_space<vmem>>, vector<64x256xf32>
    %cst = arith.constant dense<0.000000e+00> : vector<8x256xf32>
    %2 = tpu.matmul %0, %1, %cst {dimension_numbers = #tpu.dot_dimension_numbers<[1], [0], [0], [1], [0, 0, 1, 1], [], []>} : vector<8x64xf32>, vector<64x256xf32>, vector<8x256xf32> -> vector<8x256xf32>
    %3 = vector.extract_strided_slice %2 {offsets = [0, 0], sizes = [4, 256], strides = [1, 1]} : vector<8x256xf32> to vector<4x256xf32>
    %4 = vector.extract_strided_slice %2 {offsets = [4, 0], sizes = [4, 256], strides = [1, 1]} : vector<8x256xf32> to vector<4x256xf32>
    %5 = tpu.concatenate %3, %4 in 1 : vector<4x256xf32>, vector<4x256xf32> -> vector<4x512xf32>
    %cst_3 = arith.constant 0.000000e+00 : f32
    %6 = vector.broadcast %cst_3 : f32 to vector<4x128xf32>
    %7 = tpu.concatenate %6, %5, %6 in 1 : vector<4x128xf32>, vector<4x512xf32>, vector<4x128xf32> -> vector<4x768xf32>
    %8 = vector.extract_strided_slice %7 {offsets = [0, 111], sizes = [4, 512], strides = [1, 1]} : vector<4x768xf32> to vector<4x512xf32>
    %c0_4 = arith.constant 0 : index
    %c0_5 = arith.constant 0 : index
    %9 = vector.load %arg4[%c0_4, %c0_5] : memref<9x512xf32, #tpu.memory_space<vmem>>, vector<1x512xf32>
    %10 = vector.broadcast %9 : vector<1x512xf32> to vector<4x512xf32>
    %11 = arith.mulf %8, %10 : vector<4x512xf32>
    %c0_6 = arith.constant 0 : index
    %c0_7 = arith.constant 0 : index
    %12 = vector.load %arg8[%c0_6, %c0_7] : memref<36x512xf32, #tpu.memory_space<vmem>>, vector<4x512xf32>
    tpu.vector_store %arg8[%c0_6, %c0_7], %11 {strides = array<i32>} : memref<36x512xf32, #tpu.memory_space<vmem>>, vector<4x512xf32>,
    %13 = vector.extract_strided_slice %7 {offsets = [0, 112], sizes = [4, 512], strides = [1, 1]} : vector<4x768xf32> to vector<4x512xf32>
    %c1 = arith.constant 1 : index
    %c0_8 = arith.constant 0 : index
    %14 = vector.load %arg4[%c1, %c0_8] : memref<9x512xf32, #tpu.memory_space<vmem>>, vector<1x512xf32>
    %15 = vector.broadcast %14 : vector<1x512xf32> to vector<4x512xf32>
    %16 = arith.mulf %13, %15 : vector<4x512xf32>
    %c4 = arith.constant 4 : index
    %c0_9 = arith.constant 0 : index
    %17 = vector.load %arg8[%c4, %c0_9] : memref<36x512xf32, #tpu.memory_space<vmem>>, vector<4x512xf32>
    tpu.vector_store %arg8[%c4, %c0_9], %16 {strides = array<i32>} : memref<36x512xf32, #tpu.memory_space<vmem>>, vector<4x512xf32>,
    %18 = vector.extract_strided_slice %7 {offsets = [0, 113], sizes = [4, 512], strides = [1, 1]} : vector<4x768xf32> to vector<4x512xf32>
    %c2 = arith.constant 2 : index
    %c0_10 = arith.constant 0 : index
    %19 = vector.load %arg4[%c2, %c0_10] : memref<9x512xf32, #tpu.memory_space<vmem>>, vector<1x512xf32>
    %20 = vector.broadcast %19 : vector<1x512xf32> to vector<4x512xf32>
    %21 = arith.mulf %18, %20 : vector<4x512xf32>
    %c8 = arith.constant 8 : index
    %c0_11 = arith.constant 0 : index
    %22 = vector.load %arg8[%c8, %c0_11] : memref<36x512xf32, #tpu.memory_space<vmem>>, vector<4x512xf32>
    tpu.vector_store %arg8[%c8, %c0_11], %21 {strides = array<i32>} : memref<36x512xf32, #tpu.memory_space<vmem>>, vector<4x512xf32>,
    %23 = vector.extract_strided_slice %7 {offsets = [0, 127], sizes = [4, 512], strides = [1, 1]} : vector<4x768xf32> to vector<4x512xf32>
    %c3 = arith.constant 3 : index
    %c0_12 = arith.constant 0 : index
    %24 = vector.load %arg4[%c3, %c0_12] : memref<9x512xf32, #tpu.memory_space<vmem>>, vector<1x512xf32>
    %25 = vector.broadcast %24 : vector<1x512xf32> to vector<4x512xf32>
    %26 = arith.mulf %23, %25 : vector<4x512xf32>
    %c12 = arith.constant 12 : index
    %c0_13 = arith.constant 0 : index
    %27 = vector.load %arg8[%c12, %c0_13] : memref<36x512xf32, #tpu.memory_space<vmem>>, vector<4x512xf32>
    tpu.vector_store %arg8[%c12, %c0_13], %26 {strides = array<i32>} : memref<36x512xf32, #tpu.memory_space<vmem>>, vector<4x512xf32>,
    %c16 = arith.constant 16 : index
    %c0_14 = arith.constant 0 : index
    %28 = vector.load %arg8[%c16, %c0_14] : memref<36x512xf32, #tpu.memory_space<vmem>>, vector<4x512xf32>
    tpu.vector_store %arg8[%c16, %c0_14], %5 {strides = array<i32>} : memref<36x512xf32, #tpu.memory_space<vmem>>, vector<4x512xf32>,
    %29 = vector.extract_strided_slice %7 {offsets = [0, 129], sizes = [4, 512], strides = [1, 1]} : vector<4x768xf32> to vector<4x512xf32>
    %c5 = arith.constant 5 : index
    %c0_15 = arith.constant 0 : index
    %30 = vector.load %arg4[%c5, %c0_15] : memref<9x512xf32, #tpu.memory_space<vmem>>, vector<1x512xf32>
    %31 = vector.broadcast %30 : vector<1x512xf32> to vector<4x512xf32>
    %32 = arith.mulf %29, %31 : vector<4x512xf32>
    %c20 = arith.constant 20 : index
    %c0_16 = arith.constant 0 : index
    %33 = vector.load %arg8[%c20, %c0_16] : memref<36x512xf32, #tpu.memory_space<vmem>>, vector<4x512xf32>
    tpu.vector_store %arg8[%c20, %c0_16], %32 {strides = array<i32>} : memref<36x512xf32, #tpu.memory_space<vmem>>, vector<4x512xf32>,
    %34 = vector.extract_strided_slice %7 {offsets = [0, 143], sizes = [4, 512], strides = [1, 1]} : vector<4x768xf32> to vector<4x512xf32>
    %c6 = arith.constant 6 : index
    %c0_17 = arith.constant 0 : index
    %35 = vector.load %arg4[%c6, %c0_17] : memref<9x512xf32, #tpu.memory_space<vmem>>, vector<1x512xf32>
    %36 = vector.broadcast %35 : vector<1x512xf32> to vector<4x512xf32>
    %37 = arith.mulf %34, %36 : vector<4x512xf32>
    %c24 = arith.constant 24 : index
    %c0_18 = arith.constant 0 : index
    %38 = vector.load %arg8[%c24, %c0_18] : memref<36x512xf32, #tpu.memory_space<vmem>>, vector<4x512xf32>
    tpu.vector_store %arg8[%c24, %c0_18], %37 {strides = array<i32>} : memref<36x512xf32, #tpu.memory_space<vmem>>, vector<4x512xf32>,
    %39 = vector.extract_strided_slice %7 {offsets = [0, 144], sizes = [4, 512], strides = [1, 1]} : vector<4x768xf32> to vector<4x512xf32>
    %c7 = arith.constant 7 : index
    %c0_19 = arith.constant 0 : index
    %40 = vector.load %arg4[%c7, %c0_19] : memref<9x512xf32, #tpu.memory_space<vmem>>, vector<1x512xf32>
    %41 = vector.broadcast %40 : vector<1x512xf32> to vector<4x512xf32>
    %42 = arith.mulf %39, %41 : vector<4x512xf32>
    %c28 = arith.constant 28 : index
    %c0_20 = arith.constant 0 : index
    %43 = vector.load %arg8[%c28, %c0_20] : memref<36x512xf32, #tpu.memory_space<vmem>>, vector<4x512xf32>
    tpu.vector_store %arg8[%c28, %c0_20], %42 {strides = array<i32>} : memref<36x512xf32, #tpu.memory_space<vmem>>, vector<4x512xf32>,
    %44 = vector.extract_strided_slice %7 {offsets = [0, 145], sizes = [4, 512], strides = [1, 1]} : vector<4x768xf32> to vector<4x512xf32>
    %c8_21 = arith.constant 8 : index
    %c0_22 = arith.constant 0 : index
    %45 = vector.load %arg4[%c8_21, %c0_22] : memref<9x512xf32, #tpu.memory_space<vmem>>, vector<1x512xf32>
    %46 = vector.broadcast %45 : vector<1x512xf32> to vector<4x512xf32>
    %47 = arith.mulf %44, %46 : vector<4x512xf32>
    %c32 = arith.constant 32 : index
    %c0_23 = arith.constant 0 : index
    %48 = vector.load %arg8[%c32, %c0_23] : memref<36x512xf32, #tpu.memory_space<vmem>>, vector<4x512xf32>
    tpu.vector_store %arg8[%c32, %c0_23], %47 {strides = array<i32>} : memref<36x512xf32, #tpu.memory_space<vmem>>, vector<4x512xf32>,
    %c0_24 = arith.constant 0 : index
    %c0_25 = arith.constant 0 : index
    %49 = vector.load %arg5[%c0_24, %c0_25] : memref<12x36xf32, #tpu.memory_space<vmem>>, vector<4x36xf32>
    %c4_26 = arith.constant 4 : index
    %c0_27 = arith.constant 0 : index
    %50 = vector.load %arg5[%c4_26, %c0_27] : memref<12x36xf32, #tpu.memory_space<vmem>>, vector<4x36xf32>
    %c0_28 = arith.constant 0 : index
    %c0_29 = arith.constant 0 : index
    %51 = vector.load %arg3[%c0_28, %c0_29] : memref<36x512xf32, #tpu.memory_space<vmem>>, vector<36x512xf32>
    %cst_30 = arith.constant dense<0.000000e+00> : vector<4x512xf32>
    %52 = tpu.matmul %49, %51, %cst_30 {dimension_numbers = #tpu.dot_dimension_numbers<[1], [0], [0], [1], [0, 0, 1, 1], [], []>} : vector<4x36xf32>, vector<36x512xf32>, vector<4x512xf32> -> vector<4x512xf32>
    %c0_31 = arith.constant 0 : index
    %c0_32 = arith.constant 0 : index
    %53 = vector.load %arg8[%c0_31, %c0_32] : memref<36x512xf32, #tpu.memory_space<vmem>>, vector<36x512xf32>
    %cst_33 = arith.constant dense<0.000000e+00> : vector<4x512xf32>
    %54 = tpu.matmul %50, %53, %cst_33 {dimension_numbers = #tpu.dot_dimension_numbers<[1], [0], [0], [1], [0, 0, 1, 1], [], []>} : vector<4x36xf32>, vector<36x512xf32>, vector<4x512xf32> -> vector<4x512xf32>
    %55 = arith.addf %52, %54 : vector<4x512xf32>
    %c0_34 = arith.constant 0 : index
    %c0_35 = arith.constant 0 : index
    %56 = vector.load %arg6[%c0_34, %c0_35] : memref<16x1xf32, #tpu.memory_space<vmem>>, vector<4x1xf32>
    %c4_36 = arith.constant 4 : index
    %c0_37 = arith.constant 0 : index
    %57 = vector.load %arg6[%c4_36, %c0_37] : memref<16x1xf32, #tpu.memory_space<vmem>>, vector<4x1xf32>
    %cst_38 = arith.constant dense<0.000000e+00> : vector<4xf32>
    %58 = vector.multi_reduction <add>, %55, %cst_38 [1] : vector<4x512xf32> to vector<4xf32>
    %59 = vector.shape_cast %58 : vector<4xf32> to vector<4x1xf32>
    %cst_39 = arith.constant 5.120000e+02 : f32
    %60 = vector.broadcast %cst_39 : f32 to vector<4x1xf32>
    %61 = arith.divf %59, %60 : vector<4x1xf32>
    %62 = vector.broadcast %61 : vector<4x1xf32> to vector<4x512xf32>
    %63 = arith.subf %55, %62 : vector<4x512xf32>
    %64 = arith.mulf %63, %63 : vector<4x512xf32>
    %cst_40 = arith.constant dense<0.000000e+00> : vector<4xf32>
    %65 = vector.multi_reduction <add>, %64, %cst_40 [1] : vector<4x512xf32> to vector<4xf32>
    %66 = vector.shape_cast %65 : vector<4xf32> to vector<4x1xf32>
    %cst_41 = arith.constant 5.120000e+02 : f32
    %67 = vector.broadcast %cst_41 : f32 to vector<4x1xf32>
    %68 = arith.divf %66, %67 : vector<4x1xf32>
    %cst_42 = arith.constant 9.99999974E-6 : f32
    %69 = vector.broadcast %cst_42 : f32 to vector<4x1xf32>
    %70 = arith.addf %68, %69 : vector<4x1xf32>
    %71 = math.rsqrt %70 : vector<4x1xf32>
    %72 = arith.mulf %71, %56 : vector<4x1xf32>
    %73 = vector.broadcast %72 : vector<4x1xf32> to vector<4x512xf32>
    %74 = arith.mulf %63, %73 : vector<4x512xf32>
    %75 = vector.broadcast %57 : vector<4x1xf32> to vector<4x512xf32>
    %76 = arith.addf %74, %75 : vector<4x512xf32>
    %cst_43 = arith.constant 0.000000e+00 : f32
    %77 = vector.broadcast %cst_43 : f32 to vector<4x512xf32>
    %78 = arith.maximumf %76, %77 : vector<4x512xf32>
    %cst_44 = arith.constant 0.000000e+00 : f32
    %79 = vector.broadcast %cst_44 : f32 to vector<4x128xf32>
    %80 = tpu.concatenate %79, %78, %79 in 1 : vector<4x128xf32>, vector<4x512xf32>, vector<4x128xf32> -> vector<4x768xf32>
    %81 = vector.extract_strided_slice %80 {offsets = [0, 111], sizes = [4, 512], strides = [1, 1]} : vector<4x768xf32> to vector<4x512xf32>
    %c0_45 = arith.constant 0 : index
    %c0_46 = arith.constant 0 : index
    %82 = vector.load %arg4[%c0_45, %c0_46] : memref<9x512xf32, #tpu.memory_space<vmem>>, vector<1x512xf32>
    %83 = vector.broadcast %82 : vector<1x512xf32> to vector<4x512xf32>
    %84 = arith.mulf %81, %83 : vector<4x512xf32>
    %c0_47 = arith.constant 0 : index
    %c0_48 = arith.constant 0 : index
    %85 = vector.load %arg9[%c0_47, %c0_48] : memref<36x512xf32, #tpu.memory_space<vmem>>, vector<4x512xf32>
    tpu.vector_store %arg9[%c0_47, %c0_48], %84 {strides = array<i32>} : memref<36x512xf32, #tpu.memory_space<vmem>>, vector<4x512xf32>,
    %86 = vector.extract_strided_slice %80 {offsets = [0, 112], sizes = [4, 512], strides = [1, 1]} : vector<4x768xf32> to vector<4x512xf32>
    %c1_49 = arith.constant 1 : index
    %c0_50 = arith.constant 0 : index
    %87 = vector.load %arg4[%c1_49, %c0_50] : memref<9x512xf32, #tpu.memory_space<vmem>>, vector<1x512xf32>
    %88 = vector.broadcast %87 : vector<1x512xf32> to vector<4x512xf32>
    %89 = arith.mulf %86, %88 : vector<4x512xf32>
    %c4_51 = arith.constant 4 : index
    %c0_52 = arith.constant 0 : index
    %90 = vector.load %arg9[%c4_51, %c0_52] : memref<36x512xf32, #tpu.memory_space<vmem>>, vector<4x512xf32>
    tpu.vector_store %arg9[%c4_51, %c0_52], %89 {strides = array<i32>} : memref<36x512xf32, #tpu.memory_space<vmem>>, vector<4x512xf32>,
    %91 = vector.extract_strided_slice %80 {offsets = [0, 113], sizes = [4, 512], strides = [1, 1]} : vector<4x768xf32> to vector<4x512xf32>
    %c2_53 = arith.constant 2 : index
    %c0_54 = arith.constant 0 : index
    %92 = vector.load %arg4[%c2_53, %c0_54] : memref<9x512xf32, #tpu.memory_space<vmem>>, vector<1x512xf32>
    %93 = vector.broadcast %92 : vector<1x512xf32> to vector<4x512xf32>
    %94 = arith.mulf %91, %93 : vector<4x512xf32>
    %c8_55 = arith.constant 8 : index
    %c0_56 = arith.constant 0 : index
    %95 = vector.load %arg9[%c8_55, %c0_56] : memref<36x512xf32, #tpu.memory_space<vmem>>, vector<4x512xf32>
    tpu.vector_store %arg9[%c8_55, %c0_56], %94 {strides = array<i32>} : memref<36x512xf32, #tpu.memory_space<vmem>>, vector<4x512xf32>,
    %96 = vector.extract_strided_slice %80 {offsets = [0, 127], sizes = [4, 512], strides = [1, 1]} : vector<4x768xf32> to vector<4x512xf32>
    %c3_57 = arith.constant 3 : index
    %c0_58 = arith.constant 0 : index
    %97 = vector.load %arg4[%c3_57, %c0_58] : memref<9x512xf32, #tpu.memory_space<vmem>>, vector<1x512xf32>
    %98 = vector.broadcast %97 : vector<1x512xf32> to vector<4x512xf32>
    %99 = arith.mulf %96, %98 : vector<4x512xf32>
    %c12_59 = arith.constant 12 : index
    %c0_60 = arith.constant 0 : index
    %100 = vector.load %arg9[%c12_59, %c0_60] : memref<36x512xf32, #tpu.memory_space<vmem>>, vector<4x512xf32>
    tpu.vector_store %arg9[%c12_59, %c0_60], %99 {strides = array<i32>} : memref<36x512xf32, #tpu.memory_space<vmem>>, vector<4x512xf32>,
    %c16_61 = arith.constant 16 : index
    %c0_62 = arith.constant 0 : index
    %101 = vector.load %arg9[%c16_61, %c0_62] : memref<36x512xf32, #tpu.memory_space<vmem>>, vector<4x512xf32>
    tpu.vector_store %arg9[%c16_61, %c0_62], %78 {strides = array<i32>} : memref<36x512xf32, #tpu.memory_space<vmem>>, vector<4x512xf32>,
    %102 = vector.extract_strided_slice %80 {offsets = [0, 129], sizes = [4, 512], strides = [1, 1]} : vector<4x768xf32> to vector<4x512xf32>
    %c5_63 = arith.constant 5 : index
    %c0_64 = arith.constant 0 : index
    %103 = vector.load %arg4[%c5_63, %c0_64] : memref<9x512xf32, #tpu.memory_space<vmem>>, vector<1x512xf32>
    %104 = vector.broadcast %103 : vector<1x512xf32> to vector<4x512xf32>
    %105 = arith.mulf %102, %104 : vector<4x512xf32>
    %c20_65 = arith.constant 20 : index
    %c0_66 = arith.constant 0 : index
    %106 = vector.load %arg9[%c20_65, %c0_66] : memref<36x512xf32, #tpu.memory_space<vmem>>, vector<4x512xf32>
    tpu.vector_store %arg9[%c20_65, %c0_66], %105 {strides = array<i32>} : memref<36x512xf32, #tpu.memory_space<vmem>>, vector<4x512xf32>,
    %107 = vector.extract_strided_slice %80 {offsets = [0, 143], sizes = [4, 512], strides = [1, 1]} : vector<4x768xf32> to vector<4x512xf32>
    %c6_67 = arith.constant 6 : index
    %c0_68 = arith.constant 0 : index
    %108 = vector.load %arg4[%c6_67, %c0_68] : memref<9x512xf32, #tpu.memory_space<vmem>>, vector<1x512xf32>
    %109 = vector.broadcast %108 : vector<1x512xf32> to vector<4x512xf32>
    %110 = arith.mulf %107, %109 : vector<4x512xf32>
    %c24_69 = arith.constant 24 : index
    %c0_70 = arith.constant 0 : index
    %111 = vector.load %arg9[%c24_69, %c0_70] : memref<36x512xf32, #tpu.memory_space<vmem>>, vector<4x512xf32>
    tpu.vector_store %arg9[%c24_69, %c0_70], %110 {strides = array<i32>} : memref<36x512xf32, #tpu.memory_space<vmem>>, vector<4x512xf32>,
    %112 = vector.extract_strided_slice %80 {offsets = [0, 144], sizes = [4, 512], strides = [1, 1]} : vector<4x768xf32> to vector<4x512xf32>
    %c7_71 = arith.constant 7 : index
    %c0_72 = arith.constant 0 : index
    %113 = vector.load %arg4[%c7_71, %c0_72] : memref<9x512xf32, #tpu.memory_space<vmem>>, vector<1x512xf32>
    %114 = vector.broadcast %113 : vector<1x512xf32> to vector<4x512xf32>
    %115 = arith.mulf %112, %114 : vector<4x512xf32>
    %c28_73 = arith.constant 28 : index
    %c0_74 = arith.constant 0 : index
    %116 = vector.load %arg9[%c28_73, %c0_74] : memref<36x512xf32, #tpu.memory_space<vmem>>, vector<4x512xf32>
    tpu.vector_store %arg9[%c28_73, %c0_74], %115 {strides = array<i32>} : memref<36x512xf32, #tpu.memory_space<vmem>>, vector<4x512xf32>,
    %117 = vector.extract_strided_slice %80 {offsets = [0, 145], sizes = [4, 512], strides = [1, 1]} : vector<4x768xf32> to vector<4x512xf32>
    %c8_75 = arith.constant 8 : index
    %c0_76 = arith.constant 0 : index
    %118 = vector.load %arg4[%c8_75, %c0_76] : memref<9x512xf32, #tpu.memory_space<vmem>>, vector<1x512xf32>
    %119 = vector.broadcast %118 : vector<1x512xf32> to vector<4x512xf32>
    %120 = arith.mulf %117, %119 : vector<4x512xf32>
    %c32_77 = arith.constant 32 : index
    %c0_78 = arith.constant 0 : index
    %121 = vector.load %arg9[%c32_77, %c0_78] : memref<36x512xf32, #tpu.memory_space<vmem>>, vector<4x512xf32>
    tpu.vector_store %arg9[%c32_77, %c0_78], %120 {strides = array<i32>} : memref<36x512xf32, #tpu.memory_space<vmem>>, vector<4x512xf32>,
    %c8_79 = arith.constant 8 : index
    %c0_80 = arith.constant 0 : index
    %122 = vector.load %arg5[%c8_79, %c0_80] : memref<12x36xf32, #tpu.memory_space<vmem>>, vector<4x36xf32>
    %c0_81 = arith.constant 0 : index
    %c0_82 = arith.constant 0 : index
    %123 = vector.load %arg9[%c0_81, %c0_82] : memref<36x512xf32, #tpu.memory_space<vmem>>, vector<36x512xf32>
    %cst_83 = arith.constant dense<0.000000e+00> : vector<4x512xf32>
    %124 = tpu.matmul %122, %123, %cst_83 {dimension_numbers = #tpu.dot_dimension_numbers<[1], [0], [0], [1], [0, 0, 1, 1], [], []>} : vector<4x36xf32>, vector<36x512xf32>, vector<4x512xf32> -> vector<4x512xf32>
    %c8_84 = arith.constant 8 : index
    %c0_85 = arith.constant 0 : index
    %125 = vector.load %arg6[%c8_84, %c0_85] : memref<16x1xf32, #tpu.memory_space<vmem>>, vector<4x1xf32>
    %c12_86 = arith.constant 12 : index
    %c0_87 = arith.constant 0 : index
    %126 = vector.load %arg6[%c12_86, %c0_87] : memref<16x1xf32, #tpu.memory_space<vmem>>, vector<4x1xf32>
    %cst_88 = arith.constant dense<0.000000e+00> : vector<4xf32>
    %127 = vector.multi_reduction <add>, %124, %cst_88 [1] : vector<4x512xf32> to vector<4xf32>
    %128 = vector.shape_cast %127 : vector<4xf32> to vector<4x1xf32>
    %cst_89 = arith.constant 5.120000e+02 : f32
    %129 = vector.broadcast %cst_89 : f32 to vector<4x1xf32>
    %130 = arith.divf %128, %129 : vector<4x1xf32>
    %131 = vector.broadcast %130 : vector<4x1xf32> to vector<4x512xf32>
    %132 = arith.subf %124, %131 : vector<4x512xf32>
    %133 = arith.mulf %132, %132 : vector<4x512xf32>
    %cst_90 = arith.constant dense<0.000000e+00> : vector<4xf32>
    %134 = vector.multi_reduction <add>, %133, %cst_90 [1] : vector<4x512xf32> to vector<4xf32>
    %135 = vector.shape_cast %134 : vector<4xf32> to vector<4x1xf32>
    %cst_91 = arith.constant 5.120000e+02 : f32
    %136 = vector.broadcast %cst_91 : f32 to vector<4x1xf32>
    %137 = arith.divf %135, %136 : vector<4x1xf32>
    %cst_92 = arith.constant 9.99999974E-6 : f32
    %138 = vector.broadcast %cst_92 : f32 to vector<4x1xf32>
    %139 = arith.addf %137, %138 : vector<4x1xf32>
    %140 = math.rsqrt %139 : vector<4x1xf32>
    %141 = arith.mulf %140, %125 : vector<4x1xf32>
    %142 = vector.broadcast %141 : vector<4x1xf32> to vector<4x512xf32>
    %143 = arith.mulf %132, %142 : vector<4x512xf32>
    %144 = vector.broadcast %126 : vector<4x1xf32> to vector<4x512xf32>
    %145 = arith.addf %143, %144 : vector<4x512xf32>
    %cst_93 = arith.constant 0.000000e+00 : f32
    %146 = vector.broadcast %cst_93 : f32 to vector<4x512xf32>
    %147 = arith.maximumf %145, %146 : vector<4x512xf32>
    %c0_94 = arith.constant 0 : index
    %c0_95 = arith.constant 0 : index
    %148 = vector.load %arg7[%c0_94, %c0_95] : memref<4x512xf32, #tpu.memory_space<vmem>>, vector<4x512xf32>
    tpu.vector_store %arg7[%c0_94, %c0_95], %147 {strides = array<i32>} : memref<4x512xf32, #tpu.memory_space<vmem>>, vector<4x512xf32>,
    return
  }
  func.func @transform_0(%arg0: i32) -> (i32, i32) {
    %c0_i32 = arith.constant 0 : i32
    %c0_i32_0 = arith.constant 0 : i32
    %c0_i32_1 = arith.constant 0 : i32
    return %c0_i32, %c0_i32_0 : i32, i32
  }
  func.func @transform_1(%arg0: i32) -> (i32, i32) {
    %c0_i32 = arith.constant 0 : i32
    %c0_i32_0 = arith.constant 0 : i32
    %c0_i32_1 = arith.constant 0 : i32
    return %c0_i32, %c0_i32_0 : i32, i32
  }
  func.func @transform_2(%arg0: i32) -> (i32, i32) {
    %c0_i32 = arith.constant 0 : i32
    %c0_i32_0 = arith.constant 0 : i32
    %c0_i32_1 = arith.constant 0 : i32
    return %c0_i32, %c0_i32_0 : i32, i32
  }
  func.func @transform_3(%arg0: i32) -> (i32, i32) {
    %c0_i32 = arith.constant 0 : i32
    %c0_i32_0 = arith.constant 0 : i32
    %c0_i32_1 = arith.constant 0 : i32
    return %c0_i32, %c0_i32_0 : i32, i32
  }
  func.func @transform_4(%arg0: i32) -> (i32, i32) {
    %c0_i32 = arith.constant 0 : i32
    %c0_i32_0 = arith.constant 0 : i32
    %c0_i32_1 = arith.constant 0 : i32
    return %c0_i32, %c0_i32_0 : i32, i32
  }
  func.func @transform_5(%arg0: i32) -> (i32, i32) {
    %c0_i32 = arith.constant 0 : i32
    %c0_i32_0 = arith.constant 0 : i32
    %c0_i32_1 = arith.constant 0 : i32
    return %c0_i32, %c0_i32_0 : i32, i32
  }
  func.func @transform_6(%arg0: i32) -> (i32, i32) {
    %c0_i32 = arith.constant 0 : i32
    %c0_i32_0 = arith.constant 0 : i32
    %c0_i32_1 = arith.constant 0 : i32
    return %c0_i32, %c0_i32_0 : i32, i32
  }
}

</mosaic_0001>

<bundles_post_ra>
// kernel: up_forward.1
= control target key start
LH: loop header
LB: loop body
LE: loop exit
PB: predicated region body
PF: predicated region fallthrough
CT: control target
= control target key end

     0   :  { %v123_v0 = vlaneseq  ;;  %v2018_v4 = vmov 0.0   ;;  %s2019_s27 = smov 112   ;;  %s2020_s12 = smov 127   ;;  %vm40_vm0 = vcmask 523264   ;;  %vm147_vm1 = vcmask 908288   ;;  %s2971_s1 = inlined_call_operand.vmem [shape: f32[64,256], index: 1, kind: input, shape index: {}]   ;;  %s2972_s3 = inlined_call_operand.vmem [shape: f32[9,512], index: 3, kind: input, shape index: {}]   ;;  %s2973_s0 = inlined_call_operand.vmem [shape: f32[8,64], index: 0, kind: input, shape index: {}]   ;;  %s2974_s4 = inlined_call_operand.vmem [shape: f32[12,36], index: 4, kind: input, shape index: {}]   ;;  %s2975_s2 = inlined_call_operand.vmem [shape: f32[36,512], index: 2, kind: input, shape index: {}]   ;;  %s2976_s5 = inlined_call_operand.vmem [shape: f32[16,1], index: 5, kind: input, shape index: {}]   ;;  %s2977_s6 = inlined_call_operand.vmem [shape: f32[4,512], index: 6, kind: output, shape index: {}]  }
   0x1   :  { %v25_v1 = vld [vmem:[%s2971_s1 + $0x8] sm:$0xff]  ;;  %v27_v2 = vld [vmem:[%s2971_s1 + $0x18] sm:$0xff]  ;;  %v24_v3 = vld [vmem:[%s2971_s1] sm:$0xff]  ;;  %108 = vmatprep.mubr.f32.mxu0 %v2018_v4  ;;  %811 = vmatprep.mubr.f32.mxu1 %v2018_v4  ;;  %s2021_s14 = smov 111   ;;  %s2022_s18 = smov 113   ;;  %vm290_vm2 = vcmask 924672  }
   0x2   :  { %v1934_v5 = vpack.c.bf16 %v27_v2, %v25_v1  ;;  %v26_v6 = vld [vmem:[%s2971_s1 + $0x10] sm:$0xff]  ;;  %v2077_v7 = vshrl.u32 %v123_v0, 7  ;;  %v29_v9 = vld [vmem:[%s2971_s1 + $0x28] sm:$0xff]  ;;  %v31_v11 = vld [vmem:[%s2971_s1 + $0x38] sm:$0xff]  ;;  %s2023_s19 = smov 1   ;;  %s2024_s24 = smov 16  }
   0x3   :  { %v2082_v8 = vld [vmem:[%s2972_s3 + $0x1] ss:$8 sm:$0xf]  ;;  %v1936_v10 = vpack.c.bf16 %v26_v6, %v24_v3  ;;  %v1938_v15 = vpack.c.bf16 %v31_v11, %v29_v9  ;;  %v2133_v29 = vld [vmem:[%s2972_s3 + $0x3] ss:$8 sm:$0xf] }
   0x4   :  { %v28_v12 = vld [vmem:[%s2971_s1 + $0x20] sm:$0xff]  ;;  %v30_v13 = vld [vmem:[%s2971_s1 + $0x30] sm:$0xff]  ;;  %1935 = vmatprep.subr.bf16.mxu0 %v1934_v5  ;;  %v2097_v14 = vsub.s32 0, %v2077_v7  ;;  %v2100_v16 = vsub.s32 1, %v2077_v7  ;;  %v33_v17 = vld [vmem:[%s2971_s1 + $0x48] sm:$0xff]  ;;  %v2109_v20 = vsub.s32 2, %v2077_v7 }
   0x5   :  { %v35_v18 = vld [vmem:[%s2971_s1 + $0x58] sm:$0xff]  ;;  %1937 = vmatpush1.bf16.msra.mxu0 %v1936_v10  ;;  %v1940_v19 = vpack.c.bf16 %v30_v13, %v28_v12  ;;  %v32_v23 = vld [vmem:[%s2971_s1 + $0x40] sm:$0xff]  ;;  %v34_v24 = vld [vmem:[%s2971_s1 + $0x50] sm:$0xff]  ;;  %v2198_v58 = vsub.s32 3, %v2077_v7  ;;  %s2025_s25 = smov 15   ;;  %s2026_s29 = smov 17  }
   0x6   :  { %v195_v21 = vrot.slane %v2082_v8, %v2097_v14  ;;  %1939 = vmatprep.subr.bf16.mxu0 %v1938_v15  ;;  %v1942_v22 = vpack.c.bf16 %v35_v18, %v33_v17  ;;  %v37_v25 = vld [vmem:[%s2971_s1 + $0x68] sm:$0xff]  ;;  %v39_v26 = vld [vmem:[%s2971_s1 + $0x78] sm:$0xff]  ;;  %v203_v27 = vrot.slane %v2082_v8, %v2109_v20  ;;  %v199_v28 = vrot.slane %v2082_v8, %v2100_v16  ;;  %v36_v33 = vld [vmem:[%s2971_s1 + $0x60] sm:$0xff] }
   0x7   :  { %v1944_v30 = vpack.c.bf16 %v34_v24, %v32_v23  ;;  %v338_v31 = vrot.slane %v2133_v29, %v2097_v14  ;;  %v1946_v32 = vpack.c.bf16 %v39_v26, %v37_v25  ;;  %v38_v34 = vld [vmem:[%s2971_s1 + $0x70] sm:$0xff]  ;;  %v342_v35 = vrot.slane %v2133_v29, %v2100_v16  ;;  %v23_v40 = vld [vmem:[%s2973_s0] sm:$0xff] }
   0x8   :  { %208 = vrot.lane.b32.xlu0 %v195_v21, %s2019_s27  ;;  %212 = vrot.lane.b32.xlu1 %v203_v27, %s2019_s27  ;;  %v1948_v36 = vpack.c.bf16 %v38_v34, %v36_v33  ;;  %v121_v37 = vld [vmem:[%s2972_s3] ss:$8 sm:$0xf]  ;;  %v346_v38 = vrot.slane %v2133_v29, %v2109_v20  ;;  %v1903_v43 = vld [vmem:[%s2972_s3 + $0x2] ss:$8 sm:$0xf]  ;;  %v207_v60 = vrot.slane %v2082_v8, %v2198_v58 }
   0x9   :  { %1941 = vmatpush1.bf16.msra.mxu0 %v1940_v19  ;;  %v126_v39 = vrot.slane %v121_v37, %v2097_v14  ;;  %v130_v41 = vrot.slane %v121_v37, %v2100_v16  ;;  %v134_v42 = vrot.slane %v121_v37, %v2109_v20  ;;  %v269_v44 = vrot.slane %v1903_v43, %v2097_v14  ;;  %v1905_v46 = vld [vmem:[%s2972_s3 + $0x5] ss:$8 sm:$0xf]  ;;  %v1907_v51 = vld [vmem:[%s2972_s3 + $0x7] ss:$8 sm:$0xf] }
   0xa   :  { %1943 = vmatprep.subr.bf16.mxu0 %v1942_v22  ;;  %v273_v45 = vrot.slane %v1903_v43, %v2100_v16  ;;  %v277_v47 = vrot.slane %v1903_v43, %v2109_v20  ;;  %v416_v48 = vrot.slane %v1905_v46, %v2097_v14  ;;  %v420_v49 = vrot.slane %v1905_v46, %v2100_v16  ;;  %v1906_v54 = vld [vmem:[%s2972_s3 + $0x6] ss:$8 sm:$0xf]  ;;  %v1908_v0 = vld [vmem:[%s2972_s3 + $0x20] ss:$8 sm:$0xf] }
   0xb   :  { %v424_v50 = vrot.slane %v1905_v46, %v2109_v20  ;;  %v555_v52 = vrot.slane %v1907_v51, %v2097_v14  ;;  %v559_v53 = vrot.slane %v1907_v51, %v2100_v16  ;;  %v563_v55 = vrot.slane %v1907_v51, %v2109_v20 }
   0xc   :  { %210 = vrot.lane.b32.xlu0 %v199_v28, %s2019_s27  ;;  %351 = vrot.lane.b32.xlu1 %v338_v31, %s2020_s12  ;;  %v488_v56 = vrot.slane %v1906_v54, %v2097_v14  ;;  %v492_v57 = vrot.slane %v1906_v54, %v2100_v16  ;;  %v496_v59 = vrot.slane %v1906_v54, %v2109_v20  ;;  %vm216_vm3 = vcmask 916480  }
   0xd   :  { %1945 = vmatpush1.bf16.msra.mxu0 %v1944_v30  ;;  %v350_v61 = vrot.slane %v2133_v29, %v2198_v58  ;;  %v138_v62 = vrot.slane %v121_v37, %v2198_v58  ;;  %v281_v63 = vrot.slane %v1903_v43, %v2198_v58  ;;  %v627_v1 = vrot.slane %v1908_v0, %v2097_v14 }
   0xe   :  { %1947 = vmatprep.subr.bf16.mxu0 %v1946_v32  ;;  %v631_v2 = vrot.slane %v1908_v0, %v2100_v16  ;;  %v635_v3 = vrot.slane %v1908_v0, %v2109_v20  ;;  %v428_v5 = vrot.slane %v1905_v46, %v2198_v58  ;;  %v567_v6 = vrot.slane %v1907_v51, %v2198_v58 }
   0xf   :  { %v500_v7 = vrot.slane %v1906_v54, %v2198_v58  ;;  %v639_v8 = vrot.slane %v1908_v0, %v2198_v58  ;;  %vm319_vm4 = vcmask 121856   ;;  %vm359_vm5 = vcmask 1039360  }
  0x10   :  { %353 = vrot.lane.b32.xlu0 %v342_v35, %s2020_s12  ;;  %355 = vrot.lane.b32.xlu1 %v346_v38, %s2020_s12  ;;  %vm176_vm6 = vcmask 138240   ;;  %vm393_vm7 = vcmask 7168   ;;  %vm250_vm8 = vcmask 130048   ;;  %vm734_vm9 = vcmask 1043456  }
  0x11   :  { %1949 = vmatpush1.bf16.msra.mxu0 %v1948_v36  ;;  %vm730_vm10 = vcmask 293888  }
  0x14   :  { %139 = vrot.lane.b32.xlu0 %v126_v39, %s2021_s14  ;;  %1901 = vmatmul.mubr.msk.f32.vlgmr.msra.gmra.mrb[0].mxu0 %vm40_vm0, %v23_v40 }
  0x15   :  { %141 = vrot.lane.b32.xlu1 %v130_v41, %s2021_s14  ;;  %1754 = vmatprep.mubr.f32.mxu0 %v2018_v4 }
  0x18   :  { %143 = vrot.lane.b32.xlu0 %v134_v42, %s2021_s14 }
  0x19   :  { %282 = vrot.lane.b32.xlu1 %v269_v44, %s2022_s18 }
  0x1c   :  { %284 = vrot.lane.b32.xlu0 %v273_v45, %s2022_s18 }
  0x1d   :  { %286 = vrot.lane.b32.xlu1 %v277_v47, %s2022_s18 }
  0x20   :  { %429 = vrot.lane.b32.xlu0 %v416_v48, %s2023_s19 }
  0x21   :  { %431 = vrot.lane.b32.xlu1 %v420_v49, %s2023_s19 }
  0x24   :  { %433 = vrot.lane.b32.xlu0 %v424_v50, %s2023_s19 }
  0x25   :  { %568 = vrot.lane.b32.xlu1 %v555_v52, %s2024_s24 }
  0x28   :  { %570 = vrot.lane.b32.xlu0 %v559_v53, %s2024_s24 }
  0x29   :  { %572 = vrot.lane.b32.xlu1 %v563_v55, %s2024_s24 }
  0x2c   :  { %501 = vrot.lane.b32.xlu0 %v488_v56, %s2025_s25 }
  0x2d   :  { %503 = vrot.lane.b32.xlu1 %v492_v57, %s2025_s25 }
  0x30   :  { %505 = vrot.lane.b32.xlu0 %v496_v59, %s2025_s25 }
  0x31   :  { %214 = vrot.lane.b32.xlu1 %v207_v60, %s2019_s27 }
  0x34   :  { %357 = vrot.lane.b32.xlu0 %v350_v61, %s2020_s12 }
  0x35   :  { %145 = vrot.lane.b32.xlu1 %v138_v62, %s2021_s14 }
  0x38   :  { %288 = vrot.lane.b32.xlu0 %v281_v63, %s2022_s18 }
  0x39   :  { %640 = vrot.lane.b32.xlu1 %v627_v1, %s2026_s29 }
  0x3c   :  { %642 = vrot.lane.b32.xlu0 %v631_v2, %s2026_s29 }
  0x3d   :  { %644 = vrot.lane.b32.xlu1 %v635_v3, %s2026_s29 }
  0x40   :  { %435 = vrot.lane.b32.xlu0 %v428_v5, %s2023_s19 }
  0x41   :  { %574 = vrot.lane.b32.xlu1 %v567_v6, %s2024_s24 }
  0x44   :  { %507 = vrot.lane.b32.xlu0 %v500_v7, %s2025_s25 }
  0x45   :  { %646 = vrot.lane.b32.xlu1 %v639_v8, %s2026_s29 }
  0x7a   :  { %v2231_v9 = vpop.permute.xlu0 %208  ;;  %v2233_v10 = vpop.permute.xlu1 %212 }
  0x7b   :  { %v225_v35 = vmul.f32 0.0, %v2231_v9 }
  0x7d   :  { %v235_v38 = vrot.slane %v225_v35, 4 }
  0x7e   :  { %v2235_v11 = vpop.permute.xlu0 %210  ;;  %v2237_v12 = vpop.permute.xlu1 %351 }
  0x7f   :  { %v368_v37 = vmul.f32 0.0, %v2237_v12  ;;  %v217_v61 = vsel %vm216_vm3, %v2231_v9, %v2235_v11 }
  0x81   :  { %v378_v40 = vrot.slane %v368_v37, 4 }
  0x82   :  { %v2239_v13 = vpop.permute.xlu0 %353  ;;  %v2241_v15 = vpop.permute.xlu1 %355 }
  0x83   :  { %v360_v3 = vsel %vm359_vm5, %v2237_v12, %v2239_v13 }
  0x86   :  { %v140_v17 = vpop.permute.xlu0 %139 }
  0x87   :  { %v156_v18 = vmul.f32 0.0, %v140_v17  ;;  %v142_v19 = vpop.permute.xlu1 %141 }
  0x88   :  { %v148_v48 = vsel %vm147_vm1, %v140_v17, %v142_v19 }
  0x89   :  { %166 = vrot.lane.b32.xlu0 %v156_v18, %s2026_s29 }
  0x8a   :  { %v2244_v21 = vpop.permute.xlu0 %143 }
  0x8b   :  { %v283_v22 = vpop.permute.xlu1 %282  ;;  %v149_v62 = vsel %vm147_vm1, %v142_v19, %v2244_v21 }
  0x8c   :  { %v299_v23 = vmul.f32 0.0, %v283_v22 }
  0x8e   :  { %v2246_v24 = vpop.permute.xlu0 %284  ;;  %309 = vrot.lane.b32.xlu0 %v299_v23, %s2025_s25 }
  0x8f   :  { %v2274_v42 = vpop.permute.xlu1 %286  ;;  %v291_v56 = vsel %vm290_vm2, %v283_v22, %v2246_v24 }
  0x90   :  { %v292_v5 = vsel %vm290_vm2, %v2246_v24, %v2274_v42 }
  0x92   :  { %v2249_v25 = vpop.permute.xlu0 %429 }
  0x93   :  { %v2277_v43 = vpop.permute.xlu1 %431 }
  0x96   :  { %v2251_v26 = vpop.permute.xlu0 %433 }
  0x97   :  { %v2279_v44 = vpop.permute.xlu1 %568 }
  0x9a   :  { %v2253_v27 = vpop.permute.xlu0 %570 }
  0x9b   :  { %v2281_v45 = vpop.permute.xlu1 %572 }
  0x9e   :  { %v502_v28 = vpop.permute.xlu0 %501 }
  0x9f   :  { %v504_v46 = vpop.permute.xlu1 %503 }
  0xa0   :  { %v509_v63 = vsel %vm319_vm4, %v502_v28, %v504_v46 }
  0xa2   :  { %v2255_v29 = vpop.permute.xlu0 %505 }
  0xa3   :  { %v2283_v47 = vpop.permute.xlu1 %214  ;;  %v510_v19 = vsel %vm319_vm4, %v504_v46, %v2255_v29 }
  0xa6   :  { %v2257_v30 = vpop.permute.xlu0 %357 }
  0xa7   :  { %v2286_v49 = vpop.permute.xlu1 %145 }
  0xaa   :  { %v2259_v31 = vpop.permute.xlu0 %288 }
  0xab   :  { %v641_v57 = vpop.permute.xlu1 %640 }
  0xae   :  { %v2261_v32 = vpop.permute.xlu0 %642 }
  0xaf   :  { %v648_v9 = vsel %vm176_vm6, %v641_v57, %v2261_v32  ;;  %v2338_v35 = vpop.permute.xlu1 %644 }
  0xb2   :  { %v2263_v33 = vpop.permute.xlu0 %435 }
  0xb3   :  { %v449_v39 = vmul.f32 0.0, %v2263_v33 }
  0xb5   :  { %v459_v41 = vrot.slane %v449_v39, 4  ;;  %v437_v39 = vsel %vm393_vm7, %v2249_v25, %v2277_v43 }
  0xb6   :  { %v2265_v34 = vpop.permute.xlu0 %507 }
  0xb7   :  { %v521_v36 = vmul.f32 0.0, %v2265_v34 }
  0xb9   :  { %535 = vrot.lane.b32.xlu1 %v521_v36, %s2022_s18 }
  0xbd   :  { %240 = vrot.lane.b32.xlu1 %v235_v38, %s2024_s24  ;;  %v218_v38 = vsel %vm216_vm3, %v2235_v11, %v2233_v10 }
  0xc1   :  { %383 = vrot.lane.b32.xlu1 %v378_v40, %s2023_s19  ;;  %v649_v40 = vsel %vm176_vm6, %v2261_v32, %v2338_v35  ;;  %v576_v32 = vsel %vm250_vm8, %v2279_v44, %v2253_v27 }
  0xc5   :  { %468 = vrot.lane.b32.xlu1 %v459_v41, %s2020_s12 }
  0xe7   :  { %v110_v50 = vpop.f32.mrb[0].mxu0 }
  0xe8   :  { %v2288_v51 = vrot.slane %v110_v50, 4  ;;  %406 = vst [vmem:[#allocation2 + $0x40] sm:$0xf] %v110_v50  ;;  %v2290_v52 = vpop.f32.mrb[1].mxu0  ;;  %v517_v53 = vmul.f32 %v502_v28, %v110_v50  ;;  %v157_v54 = vmul.f32 %v148_v48, %v110_v50  ;;  %v656_v59 = vmul.f32 %v641_v57, %v110_v50 }
  0xe9   :  { %v2293_v55 = vrot.slane %v2290_v52, 4  ;;  %407 = vst [vmem:[#allocation2 + $0x48] sm:$0xf] %v2290_v52  ;;  %v300_v60 = vmul.f32 %v291_v56, %v110_v50  ;;  %v518_v0 = vmul.f32 %v509_v63, %v2290_v52  ;;  %v158_v1 = vmul.f32 %v149_v62, %v2290_v52 }
  0xea   :  { %408 = vst [vmem:[#allocation2 + $0x50] sm:$0xf] %v2288_v51  ;;  %527 = vrot.lane.b32.xlu1 %v517_v53, %s2022_s18  ;;  %168 = vrot.lane.b32.xlu0 %v157_v54, %s2026_s29  ;;  %v226_v2 = vmul.f32 %v217_v61, %v110_v50  ;;  %v301_v7 = vmul.f32 %v292_v5, %v2290_v52 }
  0xeb   :  { %409 = vst [vmem:[#allocation2 + $0x58] sm:$0xf] %v2293_v55  ;;  %v369_v8 = vmul.f32 %v360_v3, %v110_v50  ;;  %v657_v18 = vmul.f32 %v648_v9, %v2290_v52  ;;  %v445_v12 = vmul.f32 %v2249_v25, %v110_v50  ;;  %v519_v23 = vmul.f32 %v510_v19, %v2288_v51  ;;  %v575_v3 = vpop.permute.xlu1 %574 }
  0xec   :  { %v236_v6 = vrot.slane %v226_v2, 4  ;;  %v584_v24 = vmul.f32 %v2279_v44, %v110_v50  ;;  %v150_v28 = vsel %vm147_vm1, %v2244_v21, %v2286_v49  ;;  %v293_v21 = vsel %vm290_vm2, %v2274_v42, %v2259_v31 }
  0xed   :  { %v379_v17 = vrot.slane %v369_v8, 4  ;;  %v455_v22 = vrot.slane %v445_v12, 4  ;;  %v159_v37 = vmul.f32 %v150_v28, %v2288_v51  ;;  %v658_v41 = vmul.f32 %v649_v40, %v2288_v51 }
  0xee   :  { %666 = vrot.lane.b32.xlu1 %v656_v59, %s2021_s14  ;;  %311 = vrot.lane.b32.xlu0 %v300_v60, %s2025_s25  ;;  %v594_v36 = vrot.slane %v584_v24, 4  ;;  %v302_v46 = vmul.f32 %v293_v21, %v2288_v51  ;;  %v446_v48 = vmul.f32 %v437_v39, %v2290_v52  ;;  %v227_v11 = vmul.f32 %v218_v38, %v2290_v52 }
  0xef   :  { %v361_v25 = vsel %vm359_vm5, %v2239_v13, %v2241_v15  ;;  %v585_v53 = vmul.f32 %v576_v32, %v2290_v52  ;;  %v438_v56 = vsel %vm393_vm7, %v2277_v43, %v2251_v26  ;;  %v577_v44 = vsel %vm250_vm8, %v2253_v27, %v2281_v45  ;;  %v647_v8 = vpop.permute.xlu1 %646 }
  0xf0   :  { %v456_v42 = vrot.slane %v446_v48, 4  ;;  %v237_v50 = vrot.slane %v227_v11, 4  ;;  %v370_v54 = vmul.f32 %v361_v25, %v2290_v52  ;;  %v447_v59 = vmul.f32 %v438_v56, %v2288_v51 }
  0xf1   :  { %v595_v57 = vrot.slane %v585_v53, 4  ;;  %v160_v60 = vmul.f32 %v2286_v49, %v2293_v55  ;;  %v586_v61 = vmul.f32 %v577_v44, %v2288_v51  ;;  %v219_v43 = vsel %vm216_vm3, %v2233_v10, %v2283_v47 }
  0xf2   :  { %529 = vrot.lane.b32.xlu0 %v518_v0, %s2022_s18  ;;  %170 = vrot.lane.b32.xlu1 %v158_v1, %s2026_s29  ;;  %v380_v13 = vrot.slane %v370_v54, 4  ;;  %v457_v52 = vrot.slane %v447_v59, 4  ;;  %v303_v63 = vmul.f32 %v2259_v31, %v2293_v55  ;;  %v228_v27 = vmul.f32 %v219_v43, %v2288_v51 }
  0xf3   :  { %v596_v62 = vrot.slane %v586_v61, 4  ;;  %v362_v49 = vsel %vm359_vm5, %v2241_v15, %v2257_v30  ;;  %v511_v0 = vsel %vm319_vm4, %v2255_v29, %v2265_v34  ;;  %v229_v31 = vmul.f32 %v2283_v47, %v2293_v55 }
  0xf4   :  { %v238_v1 = vrot.slane %v228_v27, 4  ;;  %v520_v10 = vmul.f32 %v511_v0, %v2293_v55  ;;  %v371_v2 = vmul.f32 %v362_v49, %v2288_v51  ;;  %v588_v5 = vmul.f32 0.0, %v575_v3 }
  0xf5   :  { %v239_v15 = vrot.slane %v229_v31, 4  ;;  %v439_v34 = vsel %vm393_vm7, %v2251_v26, %v2263_v33  ;;  %v660_v9 = vmul.f32 0.0, %v647_v8  ;;  %v650_v33 = vsel %vm176_vm6, %v2338_v35, %v647_v8 }
  0xf6   :  { %242 = vrot.lane.b32.xlu0 %v236_v6, %s2024_s24  ;;  %313 = vrot.lane.b32.xlu1 %v301_v7, %s2025_s25  ;;  %v381_v6 = vrot.slane %v371_v2, 4  ;;  %v372_v7 = vmul.f32 %v2257_v30, %v2293_v55  ;;  %v598_v29 = vrot.slane %v588_v5, 4  ;;  %v448_v51 = vmul.f32 %v439_v34, %v2293_v55 }
  0xf7   :  { %v578_v30 = vsel %vm250_vm8, %v2281_v45, %v575_v3  ;;  %v659_v12 = vmul.f32 %v650_v33, %v2293_v55 }
  0xf8   :  { %v382_v47 = vrot.slane %v372_v7, 4 }
  0xfa   :  { %385 = vrot.lane.b32.xlu0 %v379_v17, %s2023_s19  ;;  %668 = vrot.lane.b32.xlu1 %v657_v18, %s2021_s14  ;;  %v458_v17 = vrot.slane %v448_v51, 4  ;;  %v587_v18 = vmul.f32 %v578_v30, %v2293_v55 }
  0xfc   :  { %v597_v26 = vrot.slane %v587_v18, 4 }
  0xfe   :  { %460 = vrot.lane.b32.xlu0 %v455_v22, %s2020_s12  ;;  %531 = vrot.lane.b32.xlu1 %v519_v23, %s2022_s18  ;;  %v167_v22 = vpop.permute.xlu0 %166 }
 0x102   :  { %599 = vrot.lane.b32.xlu0 %v594_v36, %s2019_s27  ;;  %172 = vrot.lane.b32.xlu1 %v159_v37, %s2026_s29  ;;  %v310_v24 = vpop.permute.xlu0 %309 }
 0x106   :  { %670 = vrot.lane.b32.xlu0 %v658_v41, %s2021_s14  ;;  %315 = vrot.lane.b32.xlu1 %v302_v46, %s2025_s25 }
 0x10a   :  { %462 = vrot.lane.b32.xlu0 %v456_v42, %s2020_s12  ;;  %244 = vrot.lane.b32.xlu1 %v237_v50, %s2024_s24 }
 0x10e   :  { %601 = vrot.lane.b32.xlu0 %v595_v57, %s2019_s27  ;;  %387 = vrot.lane.b32.xlu1 %v380_v13, %s2023_s19 }
 0x112   :  { %464 = vrot.lane.b32.xlu1 %v457_v52, %s2020_s12  ;;  %174 = vrot.lane.b32.xlu0 %v160_v60, %s2026_s29 }
 0x116   :  { %603 = vrot.lane.b32.xlu1 %v596_v62, %s2019_s27  ;;  %317 = vrot.lane.b32.xlu0 %v303_v63, %s2025_s25 }
 0x11a   :  { %246 = vrot.lane.b32.xlu1 %v238_v1, %s2024_s24  ;;  %533 = vrot.lane.b32.xlu0 %v520_v10, %s2022_s18 }
 0x11e   :  { %389 = vrot.lane.b32.xlu1 %v381_v6, %s2023_s19  ;;  %248 = vrot.lane.b32.xlu0 %v239_v15, %s2024_s24 }
 0x122   :  { %391 = vrot.lane.b32.xlu0 %v382_v47, %s2023_s19  ;;  %607 = vrot.lane.b32.xlu1 %v598_v29, %s2019_s27 }
 0x126   :  { %466 = vrot.lane.b32.xlu0 %v458_v17, %s2020_s12  ;;  %674 = vrot.lane.b32.xlu1 %v660_v9, %s2021_s14 }
 0x12a   :  { %605 = vrot.lane.b32.xlu0 %v597_v26, %s2019_s27 }
 0x12b   :  { %v2425_v19 = vpop.permute.xlu1 %535 }
 0x12e   :  { %672 = vrot.lane.b32.xlu0 %v659_v12, %s2021_s14 }
 0x12f   :  { %v241_v45 = vpop.permute.xlu1 %240 }
 0x133   :  { %v384_v23 = vpop.permute.xlu1 %383 }
 0x137   :  { %v2427_v28 = vpop.permute.xlu1 %468 }
 0x15c   :  { %v528_v36 = vpop.permute.xlu1 %527  ;;  %v169_v37 = vpop.permute.xlu0 %168 }
 0x15d   :  { %v177_v38 = vsel %vm176_vm6, %v167_v22, %v169_v37 }
 0x15e   :  { %185 = vst [vmem:[#allocation2] sm:$0xf] %v177_v38 }
 0x160   :  { %v667_v35 = vpop.permute.xlu1 %666  ;;  %v312_v39 = vpop.permute.xlu0 %311 }
 0x161   :  { %v320_v21 = vsel %vm319_vm4, %v310_v24, %v312_v39 }
 0x162   :  { %328 = vst [vmem:[#allocation2 + $0x20] sm:$0xf] %v320_v21 }
 0x164   :  { %v530_v55 = vpop.permute.xlu0 %529  ;;  %v171_v40 = vpop.permute.xlu1 %170 }
 0x165   :  { %v537_v41 = vsel %vm290_vm2, %v528_v36, %v530_v55  ;;  %v178_v46 = vsel %vm176_vm6, %v169_v37, %v171_v40 }
 0x166   :  { %545 = vst [vmem:[#allocation2 + $0x60] sm:$0xf] %v537_v41  ;;  %186 = vst [vmem:[#allocation2 + $0x8] sm:$0xf] %v178_v46 }
 0x168   :  { %v243_v48 = vpop.permute.xlu0 %242  ;;  %v314_v11 = vpop.permute.xlu1 %313 }
 0x169   :  { %v251_v25 = vsel %vm250_vm8, %v241_v45, %v243_v48  ;;  %v321_v32 = vsel %vm319_vm4, %v312_v39, %v314_v11 }
 0x16a   :  { %259 = vst [vmem:[#allocation2] sm:$0xf0] %v251_v25  ;;  %329 = vst [vmem:[#allocation2 + $0x28] sm:$0xf] %v321_v32 }
 0x16c   :  { %v386_v42 = vpop.permute.xlu0 %385  ;;  %v669_v50 = vpop.permute.xlu1 %668 }
 0x16d   :  { %v394_v53 = vsel %vm393_vm7, %v384_v23, %v386_v42  ;;  %v676_v54 = vsel %vm147_vm1, %v667_v35, %v669_v50 }
 0x16e   :  { %402 = vst [vmem:[#allocation2 + $0x20] sm:$0xf0] %v394_v53  ;;  %684 = vst [vmem:[#allocation2 + $0x80] sm:$0xf] %v676_v54 }
 0x170   :  { %v461_v56 = vpop.permute.xlu0 %460  ;;  %v532_v57 = vpop.permute.xlu1 %531 }
 0x171   :  { %v538_v13 = vsel %vm290_vm2, %v530_v55, %v532_v57  ;;  %v710_v17 = vld [vmem:[#allocation2] sm:$0xff] }
 0x172   :  { %546 = vst [vmem:[#allocation2 + $0x68] sm:$0xf] %v538_v13 }
 0x174   :  { %v600_v59 = vpop.permute.xlu0 %599  ;;  %v173_v44 = vpop.permute.xlu1 %172 }
 0x175   :  { %v179_v52 = vsel %vm176_vm6, %v171_v40, %v173_v44  ;;  %v714_v34 = vld [vmem:[#allocation2 + $0x20] sm:$0xff] }
 0x176   :  { %187 = vst [vmem:[#allocation2 + $0x10] sm:$0xf] %v179_v52  ;;  %v1952_v18 = vpack.c.bf16 %v714_v34, %v710_v17  ;;  %v726_v25 = vld [vmem:[#allocation2 + $0x80] sm:$0xf]  ;;  %v707_v17 = vld [vmem:[%s2975_s2 + $0x88] sm:$0xf] }
 0x178   :  { %v2439_v60 = vpop.permute.xlu0 %670  ;;  %v316_v61 = vpop.permute.xlu1 %315 }
 0x179   :  { %v677_v43 = vsel %vm147_vm1, %v669_v50, %v2439_v60  ;;  %v322_v62 = vsel %vm319_vm4, %v314_v11, %v316_v61 }
 0x17a   :  { %685 = vst [vmem:[#allocation2 + $0x88] sm:$0xf] %v677_v43  ;;  %330 = vst [vmem:[#allocation2 + $0x30] sm:$0xf] %v322_v62 }
 0x17c   :  { %v463_v63 = vpop.permute.xlu0 %462  ;;  %v245_v27 = vpop.permute.xlu1 %244 }
 0x17d   :  { %v470_v49 = vsel %vm359_vm5, %v461_v56, %v463_v63  ;;  %v252_v0 = vsel %vm250_vm8, %v243_v48, %v245_v27  ;;  %v689_v48 = vld [vmem:[%s2974_s4 + $0x4] sm:$0xf] }
 0x17e   :  { %478 = vst [vmem:[#allocation2 + $0x40] sm:$0xf0] %v470_v49  ;;  %260 = vst [vmem:[#allocation2 + $0x8] sm:$0xf0] %v252_v0 }
 0x180   :  { %v602_v1 = vpop.permute.xlu0 %601  ;;  %v388_v10 = vpop.permute.xlu1 %387 }
 0x181   :  { %v609_v2 = vsel %vm216_vm3, %v600_v59, %v602_v1  ;;  %v395_v31 = vsel %vm393_vm7, %v386_v42, %v388_v10  ;;  %v727_v46 = vld [vmem:[#allocation2 + $0x88] sm:$0xf] }
 0x182   :  { %617 = vst [vmem:[#allocation2 + $0x60] sm:$0xf0] %v609_v2  ;;  %403 = vst [vmem:[#allocation2 + $0x28] sm:$0xf0] %v395_v31  ;;  %v691_v31 = vld [vmem:[%s2975_s2 + $0x8] sm:$0xff] }
 0x184   :  { %v465_v3 = vpop.permute.xlu1 %464  ;;  %v175_v5 = vpop.permute.xlu0 %174 }
 0x185   :  { %v471_v6 = vsel %vm359_vm5, %v463_v63, %v465_v3  ;;  %v180_v15 = vsel %vm176_vm6, %v173_v44, %v175_v5  ;;  %v711_v8 = vld [vmem:[#allocation2 + $0x8] sm:$0xff]  ;;  %v718_v55 = vld [vmem:[#allocation2 + $0x40] sm:$0xff] }
 0x186   :  { %479 = vst [vmem:[#allocation2 + $0x48] sm:$0xf0] %v471_v6  ;;  %188 = vst [vmem:[#allocation2 + $0x18] sm:$0xf] %v180_v15  ;;  %v694_v5 = vld [vmem:[%s2975_s2 + $0x20] sm:$0xff]  ;;  %v699_v15 = vld [vmem:[%s2975_s2 + $0x48] sm:$0xff] }
 0x188   :  { %v604_v7 = vpop.permute.xlu1 %603  ;;  %v318_v29 = vpop.permute.xlu0 %317 }
 0x189   :  { %v610_v47 = vsel %vm216_vm3, %v602_v1, %v604_v7  ;;  %v323_v51 = vsel %vm319_vm4, %v316_v61, %v318_v29  ;;  %v715_v9 = vld [vmem:[#allocation2 + $0x28] sm:$0xff]  ;;  %v722_v36 = vld [vmem:[#allocation2 + $0x60] sm:$0xff] }
 0x18a   :  { %618 = vst [vmem:[#allocation2 + $0x68] sm:$0xf0] %v610_v47  ;;  %331 = vst [vmem:[#allocation2 + $0x38] sm:$0xf] %v323_v51  ;;  %v1950_v30 = vpack.c.bf16 %v715_v9, %v711_v8  ;;  %v1956_v40 = vpack.c.bf16 %v722_v36, %v718_v55  ;;  %v698_v8 = vld [vmem:[%s2975_s2 + $0x40] sm:$0xff] }
 0x18b   :  { %v702_v9 = vld [vmem:[%s2975_s2 + $0x60] sm:$0xff]  ;;  %v709_v55 = vld [vmem:[%s2975_s2 + $0x98] sm:$0xf] }
 0x18c   :  { %1951 = vmatprep.subr.bf16.mxu1 %v1950_v30  ;;  %v247_v26 = vpop.permute.xlu1 %246  ;;  %v534_v33 = vpop.permute.xlu0 %533  ;;  %v1972_v30 = vpack.c.bf16 %v702_v9, %v698_v8  ;;  %v688_v36 = vld [vmem:[%s2974_s4] sm:$0xf] }
 0x18d   :  { %v253_v12 = vsel %vm250_vm8, %v245_v27, %v247_v26  ;;  %v539_v45 = vsel %vm290_vm2, %v532_v57, %v534_v33  ;;  %v540_v22 = vsel %vm290_vm2, %v534_v33, %v2425_v19  ;;  %1953 = vmatpush1.bf16.msra.mxu1 %v1952_v18  ;;  %v719_v35 = vld [vmem:[#allocation2 + $0x48] sm:$0xff]  ;;  %v693_v18 = vld [vmem:[%s2975_s2 + $0x18] sm:$0xff]  ;;  %v692_v33 = vld [vmem:[%s2975_s2 + $0x10] sm:$0xff] }
 0x18e   :  { %261 = vst [vmem:[#allocation2 + $0x10] sm:$0xf0] %v253_v12  ;;  %547 = vst [vmem:[#allocation2 + $0x70] sm:$0xf] %v539_v45  ;;  %v696_v12 = vld [vmem:[%s2975_s2 + $0x30] sm:$0xff]  ;;  %v701_v45 = vld [vmem:[%s2975_s2 + $0x58] sm:$0xff] }
 0x18f   :  { %548 = vst [vmem:[#allocation2 + $0x78] sm:$0xf] %v540_v22  ;;  %v705_v22 = vld [vmem:[%s2975_s2 + $0x78] sm:$0xff] }
 0x190   :  { %v390_v23 = vpop.permute.xlu1 %389  ;;  %v249_v24 = vpop.permute.xlu0 %248 }
 0x191   :  { %v396_v37 = vsel %vm393_vm7, %v388_v10, %v390_v23  ;;  %v254_v38 = vsel %vm250_vm8, %v247_v26, %v249_v24  ;;  %v723_v39 = vld [vmem:[#allocation2 + $0x68] sm:$0xff]  ;;  %v697_v26 = vld [vmem:[%s2975_s2 + $0x38] sm:$0xff] }
 0x192   :  { %404 = vst [vmem:[#allocation2 + $0x30] sm:$0xf0] %v396_v37  ;;  %262 = vst [vmem:[#allocation2 + $0x18] sm:$0xf0] %v254_v38  ;;  %v1954_v21 = vpack.c.bf16 %v723_v39, %v719_v35  ;;  %v1974_v24 = vpack.c.bf16 %v697_v26, %v693_v18  ;;  %v1976_v37 = vpack.c.bf16 %v696_v12, %v692_v33  ;;  %v700_v35 = vld [vmem:[%s2975_s2 + $0x50] sm:$0xff] }
 0x193   :  { %v1978_v38 = vpack.c.bf16 %v705_v22, %v701_v45  ;;  %v704_v39 = vld [vmem:[%s2975_s2 + $0x70] sm:$0xff] }
 0x194   :  { %1955 = vmatprep.subr.bf16.mxu1 %v1954_v21  ;;  %v392_v19 = vpop.permute.xlu0 %391  ;;  %v608_v32 = vpop.permute.xlu1 %607  ;;  %v1980_v21 = vpack.c.bf16 %v704_v39, %v700_v35  ;;  %v1923_v18 = vld [vmem:[%s2972_s3 + $0x3] ss:$8 sm:$0xf]  ;;  %v2628_v33 = vld [vmem:[%s2972_s3 + $0x6] ss:$8 sm:$0xf] }
 0x195   :  { %v397_v41 = vsel %vm393_vm7, %v390_v23, %v392_v19  ;;  %1957 = vmatpush1.bf16.msra.mxu1 %v1956_v40  ;;  %v712_v52 = vld [vmem:[#allocation2 + $0x10] sm:$0xff]  ;;  %v706_v23 = vld [vmem:[%s2975_s2 + $0x80] sm:$0xf]  ;;  %v1456_v12 = vrot.slane %v2628_v33, %v2097_v14  ;;  %v1310_v45 = vrot.slane %v1923_v18, %v2097_v14  ;;  %v1464_v22 = vrot.slane %v2628_v33, %v2109_v20 }
 0x196   :  { %405 = vst [vmem:[#allocation2 + $0x38] sm:$0xf0] %v397_v41  ;;  %1909 = vmatprep.subr.msk.mxu1 %vm734_vm9, %v727_v46  ;;  %v708_v40 = vld [vmem:[%s2975_s2 + $0x90] sm:$0xf]  ;;  %v2027_v41 = vmov 0  }
 0x197   :  { %v2551_v19 = vld [vmem:[%s2972_s3 + $0x1] ss:$8 sm:$0xf]  ;;  %2012 = vset.pattern.permute.xlu1 %v2027_v41  ;;  %v1047_v46 = vld [vmem:[%s2976_s5 + $0x4] sm:$0xf]  ;;  %2013 = vset.pattern.permute.xlu0 %v2027_v41 }
 0x198   :  { %v467_v11 = vpop.permute.xlu0 %466  ;;  %v675_v44 = vpop.permute.xlu1 %674  ;;  %1091 = vperm.xlu1 %2012, %v1047_v46   ;;  %v1177_v9 = vrot.slane %v2551_v19, %v2100_v16  ;;  %v1185_v41 = vrot.slane %v2551_v19, %v2198_v58 }
 0x199   :  { %v472_v42 = vsel %vm359_vm5, %v465_v3, %v467_v11  ;;  %v473_v50 = vsel %vm359_vm5, %v467_v11, %v2427_v28  ;;  %1910 = vmatpush1.msk.msra.mxu1 %vm734_vm9, %v726_v25  ;;  %v716_v54 = vld [vmem:[#allocation2 + $0x30] sm:$0xff]  ;;  %v713_v13 = vld [vmem:[#allocation2 + $0x18] sm:$0xff]  ;;  %v695_v3 = vld [vmem:[%s2975_s2 + $0x28] sm:$0xff] }
 0x19a   :  { %480 = vst [vmem:[#allocation2 + $0x50] sm:$0xf0] %v472_v42  ;;  %481 = vst [vmem:[#allocation2 + $0x58] sm:$0xf0] %v473_v50  ;;  %1911 = vmatmul.mubr.msk.f32.vlgmr.msra.gmra.mrb[0].mxu1 %vm730_vm10, %v689_v48  ;;  %v1960_v61 = vpack.c.bf16 %v716_v54, %v712_v52  ;;  %v1966_v29 = vpack.c.bf16 %v695_v3, %v691_v31 }
 0x19b   :  { %882 = vmatprep.mubr.f32.mxu1 %v2018_v4 }
 0x19c   :  { %v606_v53 = vpop.permute.xlu0 %605 }
 0x19d   :  { %v611_v56 = vsel %vm216_vm3, %v604_v7, %v606_v53  ;;  %v612_v57 = vsel %vm216_vm3, %v606_v53, %v608_v32  ;;  %v717_v59 = vld [vmem:[#allocation2 + $0x38] sm:$0xff]  ;;  %v703_v7 = vld [vmem:[%s2975_s2 + $0x68] sm:$0xff] }
 0x19e   :  { %619 = vst [vmem:[#allocation2 + $0x70] sm:$0xf0] %v611_v56  ;;  %620 = vst [vmem:[#allocation2 + $0x78] sm:$0xf0] %v612_v57  ;;  %v1958_v28 = vpack.c.bf16 %v717_v59, %v713_v13  ;;  %v1970_v51 = vpack.c.bf16 %v703_v7, %v699_v15 }
 0x1a0   :  { %1959 = vmatprep.subr.bf16.mxu1 %v1958_v28  ;;  %v673_v43 = vpop.permute.xlu0 %672 }
 0x1a1   :  { %v678_v62 = vsel %vm147_vm1, %v2439_v60, %v673_v43  ;;  %v679_v63 = vsel %vm147_vm1, %v673_v43, %v675_v44  ;;  %1961 = vmatpush1.bf16.msra.mxu1 %v1960_v61  ;;  %v721_v27 = vld [vmem:[#allocation2 + $0x58] sm:$0xff]  ;;  %v720_v0 = vld [vmem:[#allocation2 + $0x50] sm:$0xff]  ;;  %v690_v60 = vld [vmem:[%s2975_s2] sm:$0xff] }
 0x1a2   :  { %686 = vst [vmem:[#allocation2 + $0x90] sm:$0xf] %v678_v62  ;;  %687 = vst [vmem:[#allocation2 + $0x98] sm:$0xf] %v679_v63  ;;  %v1968_v34 = vpack.c.bf16 %v694_v5, %v690_v60 }
 0x1a3   :  { %v2566_v44 = vld [vmem:[%s2972_s3] ss:$8 sm:$0xf]  ;;  %v2576_v61 = vld [vmem:[%s2972_s3 + $0x2] ss:$8 sm:$0xf] }
 0x1a4   :  { %v1107_v28 = vrot.slane %v2566_v44, %v2097_v14  ;;  %v1115_v52 = vrot.slane %v2566_v44, %v2109_v20  ;;  %v1248_v43 = vrot.slane %v2576_v61, %v2100_v16  ;;  %v2584_v62 = vld [vmem:[%s2972_s3 + $0x5] ss:$8 sm:$0xf]  ;;  %v1252_v35 = vrot.slane %v2576_v61, %v2109_v20 }
 0x1a5   :  { %v725_v49 = vld [vmem:[#allocation2 + $0x78] sm:$0xff]  ;;  %v724_v1 = vld [vmem:[#allocation2 + $0x70] sm:$0xff]  ;;  %v1385_v63 = vrot.slane %v2584_v62, %v2097_v14  ;;  %v1389_v39 = vrot.slane %v2584_v62, %v2100_v16  ;;  %v1119_v46 = vrot.slane %v2566_v44, %v2198_v58 }
 0x1a6   :  { %v1962_v10 = vpack.c.bf16 %v725_v49, %v721_v27  ;;  %v1964_v2 = vpack.c.bf16 %v724_v1, %v720_v0  ;;  %v1393_v27 = vrot.slane %v2584_v62, %v2109_v20 }
 0x1a8   :  { %1963 = vmatprep.subr.bf16.mxu1 %v1962_v10 }
 0x1a9   :  { %1965 = vmatpush1.bf16.msra.mxu1 %v1964_v2  ;;  %v729_v6 = vld [vmem:[#allocation2 + $0x98] sm:$0xf]  ;;  %v728_v47 = vld [vmem:[#allocation2 + $0x90] sm:$0xf] }
 0x1aa   :  { %1912 = vmatprep.subr.msk.mxu1 %vm734_vm9, %v729_v6 }
 0x1ad   :  { %1913 = vmatpush1.msk.msra.mxu1 %vm734_vm9, %v728_v47 }
 0x1ae   :  { %1967 = vmatprep.subr.bf16.mxu1 %v1966_v29  ;;  %1914 = vmatmul.mubr.msk.f32.vlgmr.msra.gmra.mrb[2].mxu1 %vm730_vm10, %v689_v48  ;;  %v1173_v48 = vrot.slane %v2551_v19, %v2097_v14 }
 0x1af   :  { %1969 = vmatpush1.bf16.msra.mxu1 %v1968_v34  ;;  %968 = vmatprep.mubr.f32.mxu1 %v2018_v4 }
 0x1b0   :  { %1971 = vmatprep.subr.bf16.mxu1 %v1970_v51  ;;  %1186 = vrot.lane.b32.xlu1 %v1173_v48, %s2019_s27  ;;  %v1927_v48 = vld [vmem:[%s2972_s3 + $0x20] ss:$8 sm:$0xf] }
 0x1b3   :  { %1973 = vmatpush1.bf16.msra.mxu1 %v1972_v30  ;;  %v1181_v30 = vrot.slane %v2551_v19, %v2109_v20 }
 0x1b4   :  { %1915 = vmatprep.subr.msk.mxu1 %vm734_vm9, %v707_v17  ;;  %v1926_v17 = vld [vmem:[%s2972_s3 + $0x7] ss:$8 sm:$0xf] }
 0x1b5   :  { %v1526_v26 = vrot.slane %v1926_v17, %v2100_v16  ;;  %v1534_v19 = vrot.slane %v1926_v17, %v2198_v58 }
 0x1b7   :  { %1916 = vmatpush1.msk.msra.mxu1 %vm734_vm9, %v706_v23  ;;  %v1314_v23 = vrot.slane %v1923_v18, %v2100_v16 }
 0x1b8   :  { %1917 = vmatmul.mubr.msk.f32.vlgmr.msra.gmra.mrb[0].mxu1 %vm730_vm10, %v688_v36  ;;  %1975 = vmatprep.subr.bf16.mxu1 %v1974_v24  ;;  %v1322_v24 = vrot.slane %v1923_v18, %v2198_v58 }
 0x1b9   :  { %1977 = vmatpush1.bf16.msra.mxu1 %v1976_v37  ;;  %1039 = vmatprep.mubr.f32.mxu1 %v2018_v4  ;;  %v1111_v37 = vrot.slane %v2566_v44, %v2100_v16 }
 0x1ba   :  { %1979 = vmatprep.subr.bf16.mxu1 %v1978_v38  ;;  %v1244_v38 = vrot.slane %v2576_v61, %v2097_v14 }
 0x1bd   :  { %1981 = vmatpush1.bf16.msra.mxu1 %v1980_v21  ;;  %v1522_v21 = vrot.slane %v1926_v17, %v2097_v14 }
 0x1be   :  { %1918 = vmatprep.subr.msk.mxu1 %vm734_vm9, %v709_v55  ;;  %v1530_v55 = vrot.slane %v1926_v17, %v2109_v20 }
 0x1c1   :  { %1919 = vmatpush1.msk.msra.mxu1 %vm734_vm9, %v708_v40  ;;  %v1460_v40 = vrot.slane %v2628_v33, %v2100_v16 }
 0x1c2   :  { %1920 = vmatmul.mubr.msk.f32.vlgmr.msra.gmra.mrb[2].mxu1 %vm730_vm10, %v688_v36  ;;  %v1318_v36 = vrot.slane %v1923_v18, %v2109_v20 }
 0x28b   :  { %v970_v11 = vpop.f32.mrb[0].mxu1 }
 0x28c   :  { %v1048_v25 = vsel %vm734_vm9, %v970_v11, 0.0  ;;  %v972_v32 = vpop.f32.mrb[1].mxu1 }
 0x28d   :  { %v1049_v42 = vsel %vm734_vm9, %v972_v32, 0.0 }
 0x28e   :  { %v1050_v50 = vadd.f32 %v1049_v42, %v1048_v25  ;;  %v1601_v25 = vrot.slane %v1927_v48, %v2109_v20 }
 0x295   :  { %v1041_v53 = vpop.f32.mrb[2].mxu1 }
 0x296   :  { %v1051_v54 = vsel %vm734_vm9, %v1041_v53, 0.0  ;;  %v1043_v56 = vpop.f32.mrb[3].mxu1 }
 0x297   :  { %v1052_v57 = vadd.f32 %v1051_v54, %v1050_v50  ;;  %v1053_v13 = vsel %vm734_vm9, %v1043_v56, 0.0  ;;  %v1605_v50 = vrot.slane %v1927_v48, %v2198_v58 }
 0x299   :  { %v1054_v59 = vadd.f32 %v1053_v13, %v1052_v57 }
 0x29b   :  { %1055 = vadd.xlane.f32.xlu0 %v1054_v59 }
 0x2b1   :  { %1120 = vrot.lane.b32.xlu0 %v1107_v28, %s2021_s14 }
 0x2b5   :  { %1124 = vrot.lane.b32.xlu0 %v1115_v52, %s2021_s14  ;;  %v1046_v52 = vld [vmem:[%s2976_s5] sm:$0xf] }
 0x2b9   :  { %1259 = vrot.lane.b32.xlu0 %v1248_v43, %s2022_s18 }
 0x2bd   :  { %1398 = vrot.lane.b32.xlu0 %v1385_v63, %s2023_s19 }
 0x2c1   :  { %1402 = vrot.lane.b32.xlu0 %v1393_v27, %s2023_s19 }
 0x2c5   :  { %1537 = vrot.lane.b32.xlu0 %v1526_v26, %s2024_s24 }
 0x2c9   :  { %1469 = vrot.lane.b32.xlu0 %v1456_v12, %s2025_s25 }
 0x2cd   :  { %1473 = vrot.lane.b32.xlu0 %v1464_v22, %s2025_s25 }
 0x2d1   :  { %1329 = vrot.lane.b32.xlu0 %v1322_v24, %s2020_s12 }
 0x328   :  { %v1056_v49 = vpop.xlane.xlu0 %1055 }
 0x329   :  { %v1058_v0 = vmul.f32 0.001953125, %v1056_v49 }
 0x32b   :  { %v2593_v1 = vsub.f32 %v970_v11, %v1058_v0  ;;  %v2595_v10 = vsub.f32 %v972_v32, %v1058_v0  ;;  %v2597_v2 = vsub.f32 %v1041_v53, %v1058_v0  ;;  %v2599_v31 = vsub.f32 %v1043_v56, %v1058_v0  ;;  %v2677_v32 = vpop.permute.xlu1 %1091 }
 0x32c   :  { %v1593_v11 = vrot.slane %v1927_v48, %v2097_v14 }
 0x32d   :  { %v1063_v3 = vmul.f32 %v2593_v1, %v2593_v1  ;;  %v1064_v60 = vmul.f32 %v2595_v10, %v2595_v10  ;;  %v1065_v5 = vmul.f32 %v2597_v2, %v2597_v2  ;;  %v1066_v6 = vmul.f32 %v2599_v31, %v2599_v31 }
 0x32f   :  { %v1067_v15 = vsel %vm734_vm9, %v1063_v3, 0.0  ;;  %v1068_v7 = vsel %vm734_vm9, %v1064_v60, 0.0  ;;  %v1070_v34 = vsel %vm734_vm9, %v1065_v5, 0.0  ;;  %v1072_v51 = vsel %vm734_vm9, %v1066_v6, 0.0  ;;  %v2681_v42 = vpop.permute.xlu1 %1186 }
 0x330   :  { %v1069_v29 = vadd.f32 %v1068_v7, %v1067_v15  ;;  %v1202_v53 = vmul.f32 0.0, %v2681_v42  ;;  %v1256_v3 = vrot.slane %v2576_v61, %v2198_v58  ;;  %v1597_v6 = vrot.slane %v1927_v48, %v2100_v16 }
 0x331   :  { %v1397_v15 = vrot.slane %v2584_v62, %v2198_v58  ;;  %v1468_v61 = vrot.slane %v2628_v33, %v2198_v58 }
 0x332   :  { %v1071_v47 = vadd.f32 %v1070_v34, %v1069_v29  ;;  %v1212_v14 = vrot.slane %v1202_v53, 4  ;;  %v1121_v29 = vpop.permute.xlu0 %1120 }
 0x333   :  { %v1136_v34 = vmul.f32 0.0, %v1121_v29 }
 0x334   :  { %v1073_v8 = vadd.f32 %v1072_v51, %v1071_v47 }
 0x336   :  { %1074 = vadd.xlane.f32.xlu1 %v1073_v8  ;;  %v2725_v16 = vpop.permute.xlu0 %1124 }
 0x33a   :  { %v1260_v62 = vpop.permute.xlu0 %1259 }
 0x33e   :  { %v2727_v8 = vpop.permute.xlu0 %1398 }
 0x347   :  { %1188 = vrot.lane.b32.xlu1 %v1177_v9, %s2019_s27  ;;  %v2729_v9 = vpop.permute.xlu0 %1402 }
 0x34b   :  { %1190 = vrot.lane.b32.xlu1 %v1181_v30, %s2019_s27  ;;  %v2733_v30 = vpop.permute.xlu0 %1537 }
 0x34f   :  { %1323 = vrot.lane.b32.xlu1 %v1310_v45, %s2020_s12  ;;  %v2737_v18 = vpop.permute.xlu0 %1469 }
 0x353   :  { %1325 = vrot.lane.b32.xlu1 %v1314_v23, %s2020_s12  ;;  %v1474_v33 = vpop.permute.xlu0 %1473 }
 0x357   :  { %1327 = vrot.lane.b32.xlu1 %v1318_v36, %s2020_s12  ;;  %v2743_v45 = vpop.permute.xlu0 %1329 }
 0x35b   :  { %1122 = vrot.lane.b32.xlu1 %v1111_v37, %s2021_s14 }
 0x35f   :  { %1257 = vrot.lane.b32.xlu1 %v1244_v38, %s2022_s18 }
 0x363   :  { %1261 = vrot.lane.b32.xlu1 %v1252_v35, %s2022_s18 }
 0x367   :  { %1400 = vrot.lane.b32.xlu1 %v1389_v39, %s2023_s19 }
 0x36b   :  { %1535 = vrot.lane.b32.xlu1 %v1522_v21, %s2024_s24 }
 0x36f   :  { %1539 = vrot.lane.b32.xlu1 %v1530_v55, %s2024_s24 }
 0x373   :  { %1471 = vrot.lane.b32.xlu1 %v1460_v40, %s2025_s25 }
 0x377   :  { %1192 = vrot.lane.b32.xlu1 %v1185_v41, %s2019_s27 }
 0x37b   :  { %1126 = vrot.lane.b32.xlu1 %v1119_v46, %s2021_s14 }
 0x37f   :  { %1606 = vrot.lane.b32.xlu1 %v1593_v11, %s2026_s29 }
 0x383   :  { %1610 = vrot.lane.b32.xlu1 %v1601_v25, %s2026_s29 }
 0x387   :  { %1541 = vrot.lane.b32.xlu1 %v1534_v19, %s2024_s24 }
 0x38b   :  { %1612 = vrot.lane.b32.xlu1 %v1605_v50, %s2026_s29 }
 0x38f   :  { %1217 = vrot.lane.b32.xlu1 %v1212_v14, %s2024_s24 }
 0x3c3   :  { %v1075_v20 = vpop.xlane.xlu1 %1074 }
 0x3c4   :  { %v1076_v54 = vmul.f32 0.001953125, %v1075_v20 }
 0x3c6   :  { %v1077_v56 = vadd.f32 1e-05, %v1076_v54 }
 0x3c7   :  { %v2688_v57 = vpop.permute.xlu1 %1188 }
 0x3c8   :  { %2014 = vrsqrt.f32 %v1077_v56 }
 0x3cb   :  { %v2690_v13 = vpop.permute.xlu1 %1190 }
 0x3cc   :  { %v2695_v59 = vsel %vm216_vm3, %v2688_v57, %v2690_v13 }
 0x3cf   :  { %v1324_v44 = vpop.permute.xlu1 %1323 }
 0x3d0   :  { %v1339_v28 = vmul.f32 0.0, %v1324_v44 }
 0x3d2   :  { %v2015_v43 = vpop.eup %2014  ;;  %v1349_v63 = vrot.slane %v1339_v28, 4 }
 0x3d3   :  { %v1326_v27 = vpop.permute.xlu1 %1325  ;;  %v1079_v49 = vmul.f32 %v2015_v43, %v1046_v52 }
 0x3d4   :  { %v2701_v0 = vsel %vm359_vm5, %v1324_v44, %v1326_v27  ;;  %1354 = vrot.lane.b32.xlu1 %v1349_v63, %s2023_s19 }
 0x3d5   :  { %1082 = vperm.xlu0 %2013, %v1079_v49  }
 0x3d7   :  { %v2706_v60 = vpop.permute.xlu1 %1327 }
 0x3d8   :  { %v2710_v5 = vsel %vm359_vm5, %v1326_v27, %v2706_v60  ;;  %v1333_v52 = vsel %vm359_vm5, %v2706_v60, %v2743_v45 }
 0x3d9   :  { %1263 = vrot.lane.b32.xlu0 %v1256_v3, %s2022_s18 }
 0x3db   :  { %v2720_v7 = vpop.permute.xlu1 %1122 }
 0x3dc   :  { %v1129_v27 = vsel %vm147_vm1, %v2720_v7, %v2725_v16 }
 0x3dd   :  { %1608 = vrot.lane.b32.xlu0 %v1597_v6, %s2026_s29 }
 0x3df   :  { %v1258_v47 = vpop.permute.xlu1 %1257 }
 0x3e0   :  { %v1273_v51 = vmul.f32 0.0, %v1258_v47  ;;  %v1265_v25 = vsel %vm290_vm2, %v1258_v47, %v1260_v62 }
 0x3e1   :  { %1404 = vrot.lane.b32.xlu0 %v1397_v15, %s2023_s19 }
 0x3e3   :  { %v2731_v58 = vpop.permute.xlu1 %1261 }
 0x3e4   :  { %v1266_v15 = vsel %vm290_vm2, %v1260_v62, %v2731_v58 }
 0x3e5   :  { %1475 = vrot.lane.b32.xlu0 %v1468_v61, %s2025_s25 }
 0x3e7   :  { %v2735_v17 = vpop.permute.xlu1 %1400 }
 0x3e9   :  { %1146 = vrot.lane.b32.xlu0 %v1136_v34, %s2026_s29  ;;  %v1194_v34 = vsel %vm216_vm3, %v2681_v42, %v2688_v57  ;;  %v1406_v57 = vsel %vm393_vm7, %v2727_v8, %v2735_v17 }
 0x3eb   :  { %v2739_v26 = vpop.permute.xlu1 %1535 }
 0x3ed   :  { %1283 = vrot.lane.b32.xlu0 %v1273_v51, %s2025_s25 }
 0x3ef   :  { %v2741_v12 = vpop.permute.xlu1 %1539 }
 0x3f3   :  { %v1472_v22 = vpop.permute.xlu1 %1471 }
 0x3f4   :  { %v1477_v14 = vsel %vm319_vm4, %v2737_v18, %v1472_v22  ;;  %v1478_v47 = vsel %vm319_vm4, %v1472_v22, %v1474_v33 }
 0x3f7   :  { %v2755_v41 = vpop.permute.xlu1 %1192 }
 0x454   :  { %v1083_v23 = vpop.permute.xlu0 %1082 }
 0x455   :  { %v1085_v24 = vmul.f32 %v1083_v23, %v2593_v1  ;;  %v1086_v36 = vmul.f32 %v1083_v23, %v2595_v10  ;;  %v1087_v37 = vmul.f32 %v1083_v23, %v2597_v2  ;;  %v1088_v38 = vmul.f32 %v1083_v23, %v2599_v31 }
 0x456   :  { %v1128_v31 = vsel %vm147_vm1, %v1121_v29, %v2720_v7 }
 0x457   :  { %v1094_v35 = vadd.f32 %v2677_v32, %v1085_v24  ;;  %v1095_v39 = vadd.f32 %v2677_v32, %v1086_v36  ;;  %v1096_v21 = vadd.f32 %v2677_v32, %v1087_v37  ;;  %v1097_v55 = vadd.f32 %v2677_v32, %v1088_v38  ;;  %v1127_v32 = vpop.permute.xlu1 %1126 }
 0x458   :  { %v2753_v40 = vpop.permute.xlu0 %1263  ;;  %v1130_v42 = vsel %vm147_vm1, %v2725_v16, %v1127_v32  ;;  %v1543_v16 = vsel %vm250_vm8, %v2739_v26, %v2733_v30 }
 0x459   :  { %v2757_v46 = vmax.f32 %v1094_v35, 0.0  ;;  %v2759_v1 = vmax.f32 %v1095_v39, 0.0  ;;  %v2761_v10 = vmax.f32 %v1096_v21, 0.0  ;;  %v2763_v2 = vmax.f32 %v1097_v55, 0.0 }
 0x45b   :  { %1376 = vst [vmem:[#allocation3 + $0x40] sm:$0xf] %v2757_v46  ;;  %1377 = vst [vmem:[#allocation3 + $0x48] sm:$0xf] %v2759_v1  ;;  %v1137_v48 = vmul.f32 %v1128_v31, %v2757_v46  ;;  %v1274_v19 = vmul.f32 %v1265_v25, %v2757_v46  ;;  %v1486_v54 = vmul.f32 %v1477_v14, %v2759_v1  ;;  %v1607_v44 = vpop.permute.xlu1 %1606 }
 0x45c   :  { %1378 = vst [vmem:[#allocation3 + $0x50] sm:$0xf] %v2761_v10  ;;  %1379 = vst [vmem:[#allocation3 + $0x58] sm:$0xf] %v2763_v2  ;;  %v1609_v11 = vpop.permute.xlu0 %1608  ;;  %v1140_v43 = vmul.f32 %v1127_v32, %v2763_v2  ;;  %v2789_v63 = vmul.f32 %v1333_v52, %v2761_v10  ;;  %v1277_v3 = vmul.f32 %v2753_v40, %v2763_v2 }
 0x45d   :  { %1148 = vrot.lane.b32.xlu0 %v1137_v48, %s2026_s29  ;;  %v1138_v60 = vmul.f32 %v1129_v27, %v2759_v1  ;;  %v1275_v7 = vmul.f32 %v1266_v15, %v2759_v1  ;;  %v1487_v62 = vmul.f32 %v1478_v47, %v2761_v10  ;;  %v1203_v23 = vmul.f32 %v1194_v34, %v2757_v46 }
 0x45e   :  { %v1485_v24 = vmul.f32 %v2737_v18, %v2757_v46  ;;  %v1340_v37 = vmul.f32 %v2701_v0, %v2757_v46  ;;  %v1415_v18 = vmul.f32 %v1406_v57, %v2759_v1  ;;  %v1267_v0 = vsel %vm290_vm2, %v2731_v58, %v2753_v40 }
 0x45f   :  { %v2796_v49 = vpop.permute.xlu1 %1610  ;;  %v1213_v36 = vrot.slane %v1203_v23, 4  ;;  %v1276_v38 = vmul.f32 %v1267_v0, %v2761_v10  ;;  %v1552_v39 = vmul.f32 %v1543_v16, %v2759_v1  ;;  %v1614_v21 = vsel %vm176_vm6, %v1607_v44, %v1609_v11 }
 0x460   :  { %v2775_v50 = vpop.permute.xlu0 %1404  ;;  %v1615_v6 = vsel %vm176_vm6, %v1609_v11, %v2796_v49  ;;  %v1350_v22 = vrot.slane %v1340_v37, 4  ;;  %v1425_v35 = vrot.slane %v1415_v18, 4  ;;  %v1623_v58 = vmul.f32 %v1614_v21, %v2759_v1 }
 0x461   :  { %v1418_v53 = vmul.f32 0.0, %v2775_v50  ;;  %1285 = vrot.lane.b32.xlu0 %v1274_v19, %s2025_s25  ;;  %v1624_v61 = vmul.f32 %v1615_v6, %v2761_v10  ;;  %v1562_v55 = vrot.slane %v1552_v39, 4  ;;  %v1414_v40 = vmul.f32 %v2727_v8, %v2757_v46 }
 0x462   :  { %v1622_v31 = vmul.f32 %v1607_v44, %v2757_v46  ;;  %v1204_v11 = vmul.f32 %v2695_v59, %v2759_v1  ;;  %v1551_v25 = vmul.f32 %v2739_v26, %v2757_v46  ;;  %v1341_v8 = vmul.f32 %v2710_v5, %v2759_v1 }
 0x463   :  { %v1428_v20 = vrot.slane %v1418_v53, 4  ;;  %v1424_v48 = vrot.slane %v1414_v40, 4  ;;  %v1206_v53 = vmul.f32 %v2755_v41, %v2763_v2  ;;  %v1407_v59 = vsel %vm393_vm7, %v2735_v17, %v2729_v9  ;;  %v1542_v17 = vpop.permute.xlu1 %1541 }
 0x464   :  { %v1476_v56 = vpop.permute.xlu0 %1475  ;;  %v1214_v32 = vrot.slane %v1204_v11, 4  ;;  %v1561_v19 = vrot.slane %v1551_v25, 4  ;;  %v1351_v26 = vrot.slane %v1341_v8, 4  ;;  %v1416_v14 = vmul.f32 %v1407_v59, %v2761_v10 }
 0x465   :  { %v1489_v28 = vmul.f32 0.0, %v1476_v56  ;;  %1497 = vrot.lane.b32.xlu0 %v1486_v54, %s2022_s18  ;;  %1437 = vrot.lane.b32.xlu1 %v1428_v20, %s2020_s12  ;;  %v1479_v29 = vsel %vm319_vm4, %v1474_v33, %v1476_v56  ;;  %v1139_v33 = vmul.f32 %v1130_v42, %v2761_v10  ;;  %v1216_v46 = vrot.slane %v1206_v53, 4 }
 0x466   :  { %v1488_v51 = vmul.f32 %v1479_v29, %v2763_v2  ;;  %v1343_v20 = vmul.f32 %v2743_v45, %v2763_v2  ;;  %v1408_v5 = vsel %vm393_vm7, %v2729_v9, %v2775_v50  ;;  %v1544_v1 = vsel %vm250_vm8, %v2733_v30, %v2741_v12 }
 0x467   :  { %v1417_v54 = vmul.f32 %v1408_v5, %v2763_v2  ;;  %v1426_v56 = vrot.slane %v1416_v14, 4  ;;  %v1545_v45 = vsel %vm250_vm8, %v2741_v12, %v1542_v17  ;;  %v1196_v9 = vsel %vm216_vm3, %v2690_v13, %v2755_v41  ;;  %v1613_v27 = vpop.permute.xlu1 %1612 }
 0x468   :  { %v1353_v44 = vrot.slane %v1343_v20, 4  ;;  %v1205_v52 = vmul.f32 %v1196_v9, %v2761_v10  ;;  %v1555_v6 = vmul.f32 0.0, %v1542_v17  ;;  %v1352_v13 = vrot.slane %v2789_v63, 4 }
 0x469   :  { %1154 = vrot.lane.b32.xlu0 %v1140_v43, %s2026_s29  ;;  %1503 = vrot.lane.b32.xlu1 %v1489_v28, %s2022_s18  ;;  %v1553_v28 = vmul.f32 %v1544_v1, %v2761_v10  ;;  %v1427_v50 = vrot.slane %v1417_v54, 4  ;;  %v1554_v43 = vmul.f32 %v1545_v45, %v2763_v2  ;;  %v1626_v15 = vmul.f32 0.0, %v1613_v27 }
 0x46a   :  { %v1215_v12 = vrot.slane %v1205_v52, 4  ;;  %v1565_v10 = vrot.slane %v1555_v6, 4 }
 0x46b   :  { %v1563_v30 = vrot.slane %v1553_v28, 4 }
 0x46d   :  { %1291 = vrot.lane.b32.xlu0 %v1277_v3, %s2025_s25  ;;  %1150 = vrot.lane.b32.xlu1 %v1138_v60, %s2026_s29  ;;  %v1564_v3 = vrot.slane %v1554_v43, 4  ;;  %v1616_v60 = vsel %vm176_vm6, %v2796_v49, %v1613_v27  ;;  %v1147_v49 = vpop.permute.xlu0 %1146 }
 0x46e   :  { %v1625_v41 = vmul.f32 %v1616_v60, %v2763_v2 }
 0x471   :  { %1636 = vrot.lane.b32.xlu0 %v1624_v61, %s2021_s14  ;;  %1287 = vrot.lane.b32.xlu1 %v1275_v7, %s2025_s25  ;;  %v1284_v61 = vpop.permute.xlu0 %1283  ;;  %v1218_v7 = vpop.permute.xlu1 %1217 }
 0x475   :  { %1499 = vrot.lane.b32.xlu1 %v1487_v62, %s2022_s18  ;;  %1501 = vrot.lane.b32.xlu0 %v1488_v51, %s2022_s18  ;;  %v1355_v63 = vpop.permute.xlu1 %1354 }
 0x479   :  { %1495 = vrot.lane.b32.xlu1 %v1485_v24, %s2022_s18  ;;  %1219 = vrot.lane.b32.xlu0 %v1213_v36, %s2024_s24 }
 0x47d   :  { %1152 = vrot.lane.b32.xlu1 %v1139_v33, %s2026_s29  ;;  %1356 = vrot.lane.b32.xlu0 %v1350_v22, %s2023_s19 }
 0x481   :  { %1289 = vrot.lane.b32.xlu1 %v1276_v38, %s2025_s25  ;;  %1431 = vrot.lane.b32.xlu0 %v1425_v35, %s2020_s12 }
 0x485   :  { %1634 = vrot.lane.b32.xlu1 %v1623_v58, %s2021_s14  ;;  %1568 = vrot.lane.b32.xlu0 %v1562_v55, %s2019_s27 }
 0x489   :  { %1632 = vrot.lane.b32.xlu1 %v1622_v31, %s2021_s14  ;;  %1429 = vrot.lane.b32.xlu0 %v1424_v48, %s2020_s12 }
 0x48d   :  { %1221 = vrot.lane.b32.xlu1 %v1214_v32, %s2024_s24  ;;  %1566 = vrot.lane.b32.xlu0 %v1561_v19, %s2019_s27 }
 0x491   :  { %1358 = vrot.lane.b32.xlu1 %v1351_v26, %s2023_s19  ;;  %1225 = vrot.lane.b32.xlu0 %v1216_v46, %s2024_s24 }
 0x495   :  { %1433 = vrot.lane.b32.xlu1 %v1426_v56, %s2020_s12  ;;  %1362 = vrot.lane.b32.xlu0 %v1353_v44, %s2023_s19 }
 0x499   :  { %1570 = vrot.lane.b32.xlu1 %v1563_v30, %s2019_s27  ;;  %1435 = vrot.lane.b32.xlu0 %v1427_v50, %s2020_s12 }
 0x49d   :  { %1223 = vrot.lane.b32.xlu1 %v1215_v12, %s2024_s24  ;;  %1572 = vrot.lane.b32.xlu0 %v1564_v3, %s2019_s27 }
 0x4a1   :  { %1360 = vrot.lane.b32.xlu1 %v1352_v13, %s2023_s19  ;;  %1638 = vrot.lane.b32.xlu0 %v1625_v41, %s2021_s14 }
 0x4a5   :  { %1574 = vrot.lane.b32.xlu1 %v1565_v10, %s2019_s27 }
 0x4a9   :  { %1640 = vrot.lane.b32.xlu1 %v1626_v15, %s2021_s14 }
 0x4cf   :  { %v1149_v29 = vpop.permute.xlu0 %1148 }
 0x4d0   :  { %v1156_v34 = vsel %vm176_vm6, %v1147_v49, %v1149_v29 }
 0x4d1   :  { %1164 = vst [vmem:[#allocation3] sm:$0xf] %v1156_v34 }
 0x4d3   :  { %v1286_v47 = vpop.permute.xlu0 %1285 }
 0x4d4   :  { %v1293_v2 = vsel %vm319_vm4, %v1284_v61, %v1286_v47 }
 0x4d5   :  { %1301 = vst [vmem:[#allocation3 + $0x20] sm:$0xf] %v1293_v2 }
 0x4d7   :  { %v2904_v51 = vpop.permute.xlu1 %1437  ;;  %v1498_v62 = vpop.permute.xlu0 %1497 }
 0x4db   :  { %v1504_v23 = vpop.permute.xlu1 %1503  ;;  %v1155_v24 = vpop.permute.xlu0 %1154 }
 0x4df   :  { %v1151_v36 = vpop.permute.xlu1 %1150  ;;  %v1292_v37 = vpop.permute.xlu0 %1291 }
 0x4e0   :  { %v1157_v42 = vsel %vm176_vm6, %v1149_v29, %v1151_v36 }
 0x4e1   :  { %1165 = vst [vmem:[#allocation3 + $0x8] sm:$0xf] %v1157_v42 }
 0x4e3   :  { %v1288_v57 = vpop.permute.xlu1 %1287  ;;  %v2907_v33 = vpop.permute.xlu0 %1636 }
 0x4e4   :  { %v1294_v22 = vsel %vm319_vm4, %v1286_v47, %v1288_v57 }
 0x4e5   :  { %1302 = vst [vmem:[#allocation3 + $0x28] sm:$0xf] %v1294_v22 }
 0x4e7   :  { %v1500_v18 = vpop.permute.xlu1 %1499  ;;  %v1502_v0 = vpop.permute.xlu0 %1501 }
 0x4e8   :  { %v1506_v16 = vsel %vm290_vm2, %v1498_v62, %v1500_v18  ;;  %v1507_v38 = vsel %vm290_vm2, %v1500_v18, %v1502_v0  ;;  %v1508_v35 = vsel %vm290_vm2, %v1502_v0, %v1504_v23 }
 0x4e9   :  { %1514 = vst [vmem:[#allocation3 + $0x68] sm:$0xf] %v1506_v16  ;;  %1515 = vst [vmem:[#allocation3 + $0x70] sm:$0xf] %v1507_v38 }
 0x4ea   :  { %1516 = vst [vmem:[#allocation3 + $0x78] sm:$0xf] %v1508_v35 }
 0x4eb   :  { %v1496_v39 = vpop.permute.xlu1 %1495  ;;  %v1220_v21 = vpop.permute.xlu0 %1219 }
 0x4ec   :  { %v1505_v58 = vsel %vm290_vm2, %v1496_v39, %v1498_v62  ;;  %v1227_v55 = vsel %vm250_vm8, %v1218_v7, %v1220_v21 }
 0x4ed   :  { %1513 = vst [vmem:[#allocation3 + $0x60] sm:$0xf] %v1505_v58  ;;  %1235 = vst [vmem:[#allocation3] sm:$0xf0] %v1227_v55 }
 0x4ef   :  { %v1153_v40 = vpop.permute.xlu1 %1152  ;;  %v1357_v31 = vpop.permute.xlu0 %1356 }
 0x4f0   :  { %v1158_v48 = vsel %vm176_vm6, %v1151_v36, %v1153_v40  ;;  %v1159_v11 = vsel %vm176_vm6, %v1153_v40, %v1155_v24  ;;  %v1364_v25 = vsel %vm393_vm7, %v1355_v63, %v1357_v31 }
 0x4f1   :  { %1166 = vst [vmem:[#allocation3 + $0x10] sm:$0xf] %v1158_v48  ;;  %1167 = vst [vmem:[#allocation3 + $0x18] sm:$0xf] %v1159_v11 }
 0x4f2   :  { %1372 = vst [vmem:[#allocation3 + $0x20] sm:$0xf0] %v1364_v25 }
 0x4f3   :  { %v1290_v32 = vpop.permute.xlu1 %1289  ;;  %v1432_v19 = vpop.permute.xlu0 %1431 }
 0x4f4   :  { %v1295_v8 = vsel %vm319_vm4, %v1288_v57, %v1290_v32  ;;  %v1296_v53 = vsel %vm319_vm4, %v1290_v32, %v1292_v37  ;;  %v1655_v15 = vld [vmem:[#allocation3] sm:$0xff] }
 0x4f5   :  { %1303 = vst [vmem:[#allocation3 + $0x30] sm:$0xf] %v1295_v8  ;;  %1304 = vst [vmem:[#allocation3 + $0x38] sm:$0xf] %v1296_v53 }
 0x4f7   :  { %v1635_v59 = vpop.permute.xlu1 %1634  ;;  %v1569_v26 = vpop.permute.xlu0 %1568 }
 0x4f8   :  { %v1643_v46 = vsel %vm147_vm1, %v1635_v59, %v2907_v33 }
 0x4f9   :  { %1651 = vst [vmem:[#allocation3 + $0x88] sm:$0xf] %v1643_v46  ;;  %v1659_v12 = vld [vmem:[#allocation3 + $0x20] sm:$0xff] }
 0x4fa   :  { %v1984_v49 = vpack.c.bf16 %v1659_v12, %v1655_v15 }
 0x4fb   :  { %v1633_v14 = vpop.permute.xlu1 %1632  ;;  %v1430_v20 = vpop.permute.xlu0 %1429 }
 0x4fc   :  { %v1642_v5 = vsel %vm147_vm1, %v1633_v14, %v1635_v59  ;;  %v1439_v1 = vsel %vm359_vm5, %v1430_v20, %v1432_v19 }
 0x4fd   :  { %1650 = vst [vmem:[#allocation3 + $0x80] sm:$0xf] %v1642_v5  ;;  %1447 = vst [vmem:[#allocation3 + $0x40] sm:$0xf0] %v1439_v1 }
 0x4ff   :  { %v1222_v17 = vpop.permute.xlu1 %1221  ;;  %v1567_v54 = vpop.permute.xlu0 %1566 }
 0x500   :  { %v1228_v56 = vsel %vm250_vm8, %v1220_v21, %v1222_v17  ;;  %v1576_v44 = vsel %vm216_vm3, %v1567_v54, %v1569_v26  ;;  %v1672_v16 = vld [vmem:[#allocation3 + $0x88] sm:$0xf] }
 0x501   :  { %1236 = vst [vmem:[#allocation3 + $0x8] sm:$0xf0] %v1228_v56  ;;  %1584 = vst [vmem:[#allocation3 + $0x60] sm:$0xf0] %v1576_v44 }
 0x503   :  { %v1359_v28 = vpop.permute.xlu1 %1358  ;;  %v1226_v45 = vpop.permute.xlu0 %1225 }
 0x504   :  { %v1365_v9 = vsel %vm393_vm7, %v1357_v31, %v1359_v28  ;;  %v1663_v57 = vld [vmem:[#allocation3 + $0x40] sm:$0xff] }
 0x505   :  { %1373 = vst [vmem:[#allocation3 + $0x28] sm:$0xf0] %v1365_v9  ;;  %v1671_v35 = vld [vmem:[#allocation3 + $0x80] sm:$0xf] }
 0x507   :  { %v1434_v50 = vpop.permute.xlu1 %1433  ;;  %v1363_v30 = vpop.permute.xlu0 %1362 }
 0x508   :  { %v1440_v52 = vsel %vm359_vm5, %v1432_v19, %v1434_v50  ;;  %v1656_v13 = vld [vmem:[#allocation3 + $0x8] sm:$0xff] }
 0x509   :  { %1448 = vst [vmem:[#allocation3 + $0x48] sm:$0xf0] %v1440_v52 }
 0x50b   :  { %v1571_v43 = vpop.permute.xlu1 %1570  ;;  %v1436_v27 = vpop.permute.xlu0 %1435 }
 0x50c   :  { %v1577_v3 = vsel %vm216_vm3, %v1569_v26, %v1571_v43  ;;  %v1441_v60 = vsel %vm359_vm5, %v1434_v50, %v1436_v27  ;;  %v1442_v6 = vsel %vm359_vm5, %v1436_v27, %v2904_v51  ;;  %v1660_v41 = vld [vmem:[#allocation3 + $0x28] sm:$0xff]  ;;  %v1667_v51 = vld [vmem:[#allocation3 + $0x60] sm:$0xff] }
 0x50d   :  { %1585 = vst [vmem:[#allocation3 + $0x68] sm:$0xf0] %v1577_v3  ;;  %1449 = vst [vmem:[#allocation3 + $0x50] sm:$0xf0] %v1441_v60  ;;  %v1982_v10 = vpack.c.bf16 %v1660_v41, %v1656_v13  ;;  %v1988_v22 = vpack.c.bf16 %v1667_v51, %v1663_v57 }
 0x50e   :  { %1450 = vst [vmem:[#allocation3 + $0x58] sm:$0xf0] %v1442_v6 }
 0x50f   :  { %v1224_v61 = vpop.permute.xlu1 %1223  ;;  %1983 = vmatprep.subr.bf16.mxu0 %v1982_v10  ;;  %v1573_v7 = vpop.permute.xlu0 %1572 }
 0x510   :  { %v1229_v29 = vsel %vm250_vm8, %v1222_v17, %v1224_v61  ;;  %v1230_v34 = vsel %vm250_vm8, %v1224_v61, %v1226_v45  ;;  %v1578_v63 = vsel %vm216_vm3, %v1571_v43, %v1573_v7  ;;  %1985 = vmatpush1.bf16.msra.mxu0 %v1984_v49  ;;  %v1664_v36 = vld [vmem:[#allocation3 + $0x48] sm:$0xff] }
 0x511   :  { %1237 = vst [vmem:[#allocation3 + $0x10] sm:$0xf0] %v1229_v29  ;;  %1238 = vst [vmem:[#allocation3 + $0x18] sm:$0xf0] %v1230_v34 }
 0x512   :  { %1586 = vst [vmem:[#allocation3 + $0x70] sm:$0xf0] %v1578_v63 }
 0x513   :  { %v1361_v47 = vpop.permute.xlu1 %1360  ;;  %v1639_v2 = vpop.permute.xlu0 %1638 }
 0x514   :  { %v1366_v62 = vsel %vm393_vm7, %v1359_v28, %v1361_v47  ;;  %v1367_v23 = vsel %vm393_vm7, %v1361_v47, %v1363_v30  ;;  %v1644_v24 = vsel %vm147_vm1, %v2907_v33, %v1639_v2  ;;  %v1668_v37 = vld [vmem:[#allocation3 + $0x68] sm:$0xff]  ;;  %v1665_v8 = vld [vmem:[#allocation3 + $0x50] sm:$0xff] }
 0x515   :  { %1374 = vst [vmem:[#allocation3 + $0x30] sm:$0xf0] %v1366_v62  ;;  %1375 = vst [vmem:[#allocation3 + $0x38] sm:$0xf0] %v1367_v23  ;;  %v1986_v42 = vpack.c.bf16 %v1668_v37, %v1664_v36  ;;  %v1654_v33 = vld [vmem:[%s2974_s4 + $0x8] sm:$0xf] }
 0x516   :  { %1652 = vst [vmem:[#allocation3 + $0x90] sm:$0xf] %v1644_v24  ;;  %v1666_v25 = vld [vmem:[#allocation3 + $0x58] sm:$0xff]  ;;  %v1832_v47 = vld [vmem:[%s2976_s5 + $0x8] sm:$0xf] }
 0x517   :  { %v1575_v18 = vpop.permute.xlu1 %1574  ;;  %1987 = vmatprep.subr.bf16.mxu0 %v1986_v42 }
 0x518   :  { %v1579_v0 = vsel %vm216_vm3, %v1573_v7, %v1575_v18  ;;  %1989 = vmatpush1.bf16.msra.mxu0 %v1988_v22  ;;  %v1658_v39 = vld [vmem:[#allocation3 + $0x18] sm:$0xff]  ;;  %v1657_v55 = vld [vmem:[#allocation3 + $0x10] sm:$0xff]  ;;  %v1833_v7 = vld [vmem:[%s2976_s5 + $0xc] sm:$0xf] }
 0x519   :  { %1587 = vst [vmem:[#allocation3 + $0x78] sm:$0xf0] %v1579_v0  ;;  %1928 = vmatprep.subr.msk.mxu0 %vm734_vm9, %v1672_v16  ;;  %v1669_v11 = vld [vmem:[#allocation3 + $0x70] sm:$0xff] }
 0x51a   :  { %v1996_v53 = vpack.c.bf16 %v1669_v11, %v1665_v8 }
 0x51b   :  { %v1641_v38 = vpop.permute.xlu1 %1640 }
 0x51c   :  { %v1645_v21 = vsel %vm147_vm1, %v1639_v2, %v1641_v38  ;;  %1929 = vmatpush1.msk.msra.mxu0 %vm734_vm9, %v1671_v35  ;;  %v1662_v58 = vld [vmem:[#allocation3 + $0x38] sm:$0xff]  ;;  %v1661_v40 = vld [vmem:[#allocation3 + $0x30] sm:$0xff] }
 0x51d   :  { %1653 = vst [vmem:[#allocation3 + $0x98] sm:$0xf] %v1645_v21  ;;  %1930 = vmatmul.mubr.msk.f32.vlgmr.msra.gmra.mrb[2].mxu0 %vm730_vm10, %v1654_v33  ;;  %v1990_v31 = vpack.c.bf16 %v1662_v58, %v1658_v39  ;;  %v1992_v48 = vpack.c.bf16 %v1661_v40, %v1657_v55  ;;  %v1673_v26 = vld [vmem:[#allocation3 + $0x90] sm:$0xf] }
 0x51e   :  { %1825 = vmatprep.mubr.f32.mxu0 %v2018_v4 }
 0x51f   :  { %1991 = vmatprep.subr.bf16.mxu0 %v1990_v31 }
 0x520   :  { %1993 = vmatpush1.bf16.msra.mxu0 %v1992_v48  ;;  %v1670_v32 = vld [vmem:[#allocation3 + $0x78] sm:$0xff] }
 0x521   :  { %v1994_v19 = vpack.c.bf16 %v1670_v32, %v1666_v25 }
 0x523   :  { %1995 = vmatprep.subr.bf16.mxu0 %v1994_v19 }
 0x524   :  { %1997 = vmatpush1.bf16.msra.mxu0 %v1996_v53  ;;  %v1674_v59 = vld [vmem:[#allocation3 + $0x98] sm:$0xf] }
 0x525   :  { %1931 = vmatprep.subr.msk.mxu0 %vm734_vm9, %v1674_v59 }
 0x528   :  { %1932 = vmatpush1.msk.msra.mxu0 %vm734_vm9, %v1673_v26 }
 0x529   :  { %1933 = vmatmul.mubr.msk.f32.vlgmr.msra.gmra.mrb[4].mxu0 %vm730_vm10, %v1654_v33 }
 0x5f0   :  { %v1756_v46 = vpop.f32.mrb[2].mxu0 }
 0x5f1   :  { %v1834_v4 = vsel %vm734_vm9, %v1756_v46, 0.0  ;;  %v1758_v14 = vpop.f32.mrb[3].mxu0 }
 0x5f2   :  { %v1835_v20 = vsel %vm734_vm9, %v1758_v14, 0.0 }
 0x5f3   :  { %v1836_v5 = vadd.f32 %v1835_v20, %v1834_v4 }
 0x5fc   :  { %v1827_v1 = vpop.f32.mrb[4].mxu0 }
 0x5fd   :  { %v1837_v17 = vsel %vm734_vm9, %v1827_v1, 0.0  ;;  %v1829_v54 = vpop.f32.mrb[5].mxu0 }
 0x5fe   :  { %v1838_v56 = vadd.f32 %v1837_v17, %v1836_v5  ;;  %v1839_v44 = vsel %vm734_vm9, %v1829_v54, 0.0 }
 0x600   :  { %v1840_v28 = vadd.f32 %v1839_v44, %v1838_v56 }
 0x602   :  { %1841 = vadd.xlane.f32.xlu0 %v1840_v28 }
 0x68f   :  { %v1842_v45 = vpop.xlane.xlu0 %1841 }
 0x690   :  { %v1843_v9 = vmul.f32 0.001953125, %v1842_v45 }
 0x692   :  { %v1844_v50 = vsub.f32 %v1756_v46, %v1843_v9  ;;  %v1845_v30 = vsub.f32 %v1758_v14, %v1843_v9  ;;  %v1846_v52 = vsub.f32 %v1827_v1, %v1843_v9  ;;  %v1847_v43 = vsub.f32 %v1829_v54, %v1843_v9 }
 0x694   :  { %v1848_v27 = vmul.f32 %v1844_v50, %v1844_v50  ;;  %v1849_v12 = vmul.f32 %v1845_v30, %v1845_v30  ;;  %v1850_v3 = vmul.f32 %v1846_v52, %v1846_v52  ;;  %v1851_v60 = vmul.f32 %v1847_v43, %v1847_v43 }
 0x696   :  { %v1852_v6 = vsel %vm734_vm9, %v1848_v27, 0.0  ;;  %v1853_v13 = vsel %vm734_vm9, %v1849_v12, 0.0  ;;  %v1855_v10 = vsel %vm734_vm9, %v1850_v3, 0.0  ;;  %v1857_v49 = vsel %vm734_vm9, %v1851_v60, 0.0 }
 0x697   :  { %v1854_v41 = vadd.f32 %v1853_v13, %v1852_v6 }
 0x699   :  { %v1856_v15 = vadd.f32 %v1855_v10, %v1854_v41 }
 0x69b   :  { %v1858_v61 = vadd.f32 %v1857_v49, %v1856_v15 }
 0x69d   :  { %1859 = vadd.xlane.f32.xlu1 %v1858_v61 }
 0x6ae   :  { %1876 = vperm.xlu1 %2012, %v1833_v7  }
 0x72a   :  { %v1860_v29 = vpop.xlane.xlu1 %1859 }
 0x72b   :  { %v1861_v34 = vmul.f32 0.001953125, %v1860_v29 }
 0x72d   :  { %v1862_v63 = vadd.f32 1e-05, %v1861_v34 }
 0x72e   :  { %v1877_v42 = vpop.permute.xlu1 %1876 }
 0x72f   :  { %2016 = vrsqrt.f32 %v1862_v63 }
 0x739   :  { %v2017_v2 = vpop.eup %2016 }
 0x73a   :  { %v1864_v51 = vmul.f32 %v2017_v2, %v1832_v47 }
 0x73c   :  { %1867 = vperm.xlu0 %2013, %v1864_v51  }
 0x7bb   :  { %v1868_v62 = vpop.permute.xlu0 %1867 }
 0x7bc   :  { %v1870_v23 = vmul.f32 %v1868_v62, %v1844_v50  ;;  %v1871_v24 = vmul.f32 %v1868_v62, %v1845_v30  ;;  %v1872_v36 = vmul.f32 %v1868_v62, %v1846_v52  ;;  %v1873_v37 = vmul.f32 %v1868_v62, %v1847_v43 }
 0x7be   :  { %v1879_v57 = vadd.f32 %v1877_v42, %v1870_v23  ;;  %v1880_v22 = vadd.f32 %v1877_v42, %v1871_v24  ;;  %v1881_v18 = vadd.f32 %v1877_v42, %v1872_v36  ;;  %v1882_v0 = vadd.f32 %v1877_v42, %v1873_v37 }
 0x7c0   :  { %v1883_v16 = vmax.f32 %v1879_v57, 0.0  ;;  %v1884_v33 = vmax.f32 %v1880_v22, 0.0  ;;  %v1885_v38 = vmax.f32 %v1881_v18, 0.0  ;;  %v1886_v35 = vmax.f32 %v1882_v0, 0.0 }
 0x7c2   :  { %v1891_v39 = vcombine.low %v1883_v16, %v1884_v33  ;;  %v1892_v21 = vcombine.low %v1885_v38, %v1886_v35 }
 0x7c4   :  { %1895 = vst [vmem:[%s2977_s6] sm:$0xff] %v1891_v39  ;;  %1896 = vst [vmem:[%s2977_s6 + $0x8] sm:$0xff] %v1892_v21 }

</bundles_post_ra>
